<compile_context>
chip_gen: v6e
topology: v6e:2x2x1
jax: 0.10.0
libtpu: 0.0.40
codegen_flags: <defaults>
</compile_context>

<pallas_src>
import jax
import jax.numpy as jnp
from jax.experimental import pallas as pl
from jax.experimental.pallas import tpu as pltpu


# ----------------------------- fused Pallas kernel ------------------------------

def _make_fused_kernel(blocks_meta, n_dense, *, B, T, K):
    """blocks_meta: list of (c_in, c_out, has_downsample) per temporal block."""
    c_last = blocks_meta[-1][1]

    def kernel(*refs):
        x_ref, pos_ref = refs[0], refs[1]
        idx = 2
        blk_refs = []
        for (_, _, has_down) in blocks_meta:
            n = 6 if has_down else 4
            blk_refs.append(refs[idx:idx + n])
            idx += n
        dense_refs = [refs[idx + 2 * j: idx + 2 * j + 2] for j in range(n_dense)]
        idx += 2 * n_dense
        out_ref = refs[idx]
        hstage_ref, flat_ref = refs[idx + 1], refs[idx + 2]

        # Time-within-batch index of every row of the folded (B*T, C) activations.
        # Hoisted once; reused by every conv tap's batch-boundary mask.
        row_t = jax.lax.broadcasted_iota(jnp.int32, (B * T, 1), 0) % T

        def causal_conv(h, w_ref, b_ref, dil, c_in):
            """Causal dilated Conv1d + Chomp1d + ReLU as K per-tap shifted matmuls.

            h: (B*T, c_in) f32 register value (row = b*T + t);
            w_ref: (K, c_in, c_out); b_ref: (1, c_out).
            Tap k uses the activations shifted right in time by s = (K-1-k)*dil,
            with zeros flowing in from the causal left pad.
            """
            c_out = w_ref.shape[2]
            acc = jnp.zeros((B * T, c_out), jnp.float32)
            for k in range(K):
                s = (K - 1 - k) * dil
                if s >= T:                      # this tap only ever sees causal padding
                    continue
                if s == 0:
                    shifted = h
                else:
                    # shift rows down by s (zeros on top), entirely in registers
                    shifted = jnp.concatenate(
                        [jnp.zeros((s, c_in), jnp.float32), h[:B * T - s, :]], axis=0)
                    if B > 1:                   # rows that slid across a batch boundary -> 0
                        shifted = jnp.where(row_t >= s, shifted, 0.0)
                acc = acc + jnp.dot(shifted, w_ref[k],
                                    preferred_element_type=jnp.float32)
            # conv bias + ReLU (dropout / weight_norm are eval-mode identities)
            return jnp.maximum(acc + b_ref[...], 0.0)

        # ---- TemporalConvNet residual stack; batch folded into every matmul's M dim ----
        h = x_ref[...].astype(jnp.float32)                        # (B*T, C_in)
        for li, (c_in, c_out, has_down) in enumerate(blocks_meta):
            dil = 2 ** li
            w1, b1, w2, b2 = blk_refs[li][:4]
            a1 = causal_conv(h, w1, b1, dil, c_in)                 # conv1 -> ReLU
            a2 = causal_conv(a1, w2, b2, dil, c_out)               # conv2 -> ReLU
            if has_down:                                           # 1x1 conv residual path
                wd, bd = blk_refs[li][4], blk_refs[li][5]
                res = jnp.dot(h, wd[...], preferred_element_type=jnp.float32) + bd[...]
            else:
                res = h
            h = jnp.maximum(a2 + res, 0.0)                         # fused residual add + ReLU

        # ---- flatten (B*T, c_last) -> lane-dense (B, T*c_last) slab, (t-major, c-minor).
        #      dense weights + pos-enc were pre-permuted in the wrapper to match. ----
        hstage_ref[...] = h
        for t in range(T):
            flat_ref[:, t * c_last:(t + 1) * c_last] = (
                hstage_ref[pl.ds(t, B, stride=T), :])              # rows t, t+T, ...
        o = flat_ref[...] + pos_ref[...]                           # + positional encoding

        # ---- DenseNet head: Linear -> ReLU -> ... -> Linear (last layer lane-padded) ----
        for j in range(n_dense):
            w_ref, b_ref = dense_refs[j]
            o = jnp.dot(o, w_ref[...], preferred_element_type=jnp.float32) + b_ref[...]
            if j < n_dense - 1:
                o = jnp.maximum(o, 0.0)
        out_ref[...] = o.astype(out_ref.dtype)                     # single lane-dense store

    return kernel


# ----------------------------- glue (plain JAX, trace-time) ------------------------------

def get_position_encoding(ids, d, n, dtype):
    """getPositionEncoding: pe[b, 2i]=sin(ids[b]/n^(2i/d)), pe[b, 2i+1]=cos(...)."""
    ids = ids.reshape(-1).astype(jnp.float32)
    j = jnp.arange(d)
    denom = jnp.power(jnp.float32(n), 2.0 * (j // 2).astype(jnp.float32) / d)
    ang = ids[:, None] / denom[None, :]
    pe = jnp.where((j % 2 == 0)[None, :], jnp.sin(ang), jnp.cos(ang))
    pe = jnp.where((j < 2 * (d // 2))[None, :], pe, 0.0)   # odd-d tail stays zero (as in ref)
    return pe.astype(dtype)


def tcn_forward(data_ncw, ids, params, *, pos_enc=True):
    """data_ncw: (B, vital_signs, data_minutes) [PyTorch NCW]; ids: (B, 1)."""
    B, C0, T = data_ncw.shape
    # channels-last, batch folded into rows: row b*T + t == (b, t)
    x2d = jnp.transpose(data_ncw, (0, 2, 1)).reshape(B * T, C0)

    # --- static parameter prep (trace-time constants) ---
    blocks_meta, flat_params = [], []
    K = params["tcn"][0]["w1"].shape[0]
    for blk in params["tcn"]:
        _, c_in, c_out = blk["w1"].shape
        has_down = "wd" in blk
        flat_params += [blk["w1"], blk["b1"].reshape(1, c_out),
                        blk["w2"], blk["b2"].reshape(1, c_out)]
        if has_down:
            flat_params += [blk["wd"].reshape(c_in, c_out), blk["bd"].reshape(1, c_out)]
        blocks_meta.append((c_in, c_out, has_down))
    c_last = blocks_meta[-1][1]
    num_inputs = c_last * T                                # single_tcn flatten width

    n_dense = len(params["dense"])
    out_size = params["dense"][-1][0].shape[1]
    out_pad = ((out_size + 127) // 128) * 128              # lane-dense final store width
    for j, (w, b) in enumerate(params["dense"]):
        if j == 0:
            # PyTorch .flatten(1) order is (c*T + t); kernel builds (t*C + c) -> permute rows.
            w = w.reshape(c_last, T, w.shape[1]).transpose(1, 0, 2).reshape(num_inputs, -1)
        if j == n_dense - 1 and out_pad != out_size:
            w = jnp.pad(w, ((0, 0), (0, out_pad - out_size)))
            b = jnp.pad(b, (0, out_pad - out_size))
        flat_params += [w, b.reshape(1, -1)]

    if pos_enc:
        pe = get_position_encoding(ids, num_inputs, 10000, x2d.dtype)   # (B, d) in (c,t) order
        pos = pe.reshape(B, c_last, T).transpose(0, 2, 1).reshape(B, num_inputs)
    else:
        pos = jnp.zeros((B, num_inputs), x2d.dtype)

    kernel = _make_fused_kernel(blocks_meta, n_dense, B=B, T=T, K=K)
    out = pl.pallas_call(
        kernel,
        out_shape=jax.ShapeDtypeStruct((B, out_pad), x2d.dtype),
        scratch_shapes=[
            pltpu.VMEM((B * T, c_last), jnp.float32),      # last-block activations (flatten src)
            pltpu.VMEM((B, num_inputs), jnp.float32),      # lane-dense flattened slab
        ],
    )(x2d, pos, *flat_params)
    return out[:, :out_size]


def init_params(key, *, vital_signs, num_channels, kernel_size, data_minutes,
                dense_layers, output_size, dtype=jnp.float32):
    params = {"tcn": [], "dense": []}
    c_in = vital_signs
    for c_out in num_channels:
        key, k1, k2, k3, k4, k5, k6 = jax.random.split(key, 7)
        blk = {
            "w1": 0.1 * jax.random.normal(k1, (kernel_size, c_in, c_out), dtype),
            "b1": 0.1 * jax.random.normal(k2, (c_out,), dtype),
            "w2": 0.1 * jax.random.normal(k3, (kernel_size, c_out, c_out), dtype),
            "b2": 0.1 * jax.random.normal(k4, (c_out,), dtype),
        }
        if c_in != c_out:
            blk["wd"] = 0.1 * jax.random.normal(k5, (1, c_in, c_out), dtype)
            blk["bd"] = 0.1 * jax.random.normal(k6, (c_out,), dtype)
        params["tcn"].append(blk)
        c_in = c_out
    f_in = num_channels[-1] * data_minutes                 # num_inputs (single_tcn path)
    for h in list(dense_layers) + [output_size]:
        key, k1, k2 = jax.random.split(key, 3)
        params["dense"].append((0.1 * jax.random.normal(k1, (f_in, h), dtype),
                                0.1 * jax.random.normal(k2, (h,), dtype)))
        f_in = h
    return params


if __name__ == "__main__":
    # Small config: batch=2, vital_signs=4, data_minutes=16, channels=[8, 8],
    # dense_layers=[64], output_size=3, kernel_size=3, pos_enc=True.
    B, vital_signs, data_minutes = 2, 4, 16
    num_channels = [8, 8]
    dense_layers = [64]
    output_size = 3
    kernel_size = 3

    key = jax.random.PRNGKey(0)
    key, k_data, k_params = jax.random.split(key, 3)

    data = jax.random.normal(k_data, (B, vital_signs, data_minutes), jnp.float32)  # NCW
    ids = jnp.array([[3.0], [7.0]], jnp.float32)                                   # (B, 1)

    params = init_params(
        k_params, vital_signs=vital_signs, num_channels=num_channels,
        kernel_size=kernel_size, data_minutes=data_minutes,
        dense_layers=dense_layers, output_size=output_size)

    fwd = jax.jit(lambda d, i: tcn_forward(d, i, params, pos_enc=True))
    out = jax.block_until_ready(fwd(data, ids))
    assert out.shape == (B, output_size) and out.dtype == jnp.float32
    print("KERNEL_OK")
</pallas_src>

<mosaic_0001>
module attributes {stable_mosaic.version = 11 : i64} {
  func.func @kernel(%arg0: memref<32x4xf32, #tpu.memory_space<vmem>>, %arg1: memref<2x128xf32, #tpu.memory_space<vmem>>, %arg2: memref<3x4x8xf32, #tpu.memory_space<vmem>>, %arg3: memref<1x8xf32, #tpu.memory_space<vmem>>, %arg4: memref<3x8x8xf32, #tpu.memory_space<vmem>>, %arg5: memref<1x8xf32, #tpu.memory_space<vmem>>, %arg6: memref<4x8xf32, #tpu.memory_space<vmem>>, %arg7: memref<1x8xf32, #tpu.memory_space<vmem>>, %arg8: memref<3x8x8xf32, #tpu.memory_space<vmem>>, %arg9: memref<1x8xf32, #tpu.memory_space<vmem>>, %arg10: memref<3x8x8xf32, #tpu.memory_space<vmem>>, %arg11: memref<1x8xf32, #tpu.memory_space<vmem>>, %arg12: memref<128x64xf32, #tpu.memory_space<vmem>>, %arg13: memref<1x64xf32, #tpu.memory_space<vmem>>, %arg14: memref<64x128xf32, #tpu.memory_space<vmem>>, %arg15: memref<1x128xf32, #tpu.memory_space<vmem>>, %arg16: memref<2x128xf32, #tpu.memory_space<vmem>>, %arg17: memref<32x8xf32, #tpu.memory_space<vmem>>, %arg18: memref<2x128xf32, #tpu.memory_space<vmem>>) attributes {dimension_semantics = [], scalar_prefetch = 0 : i64, scratch_operands = 2 : i64, tpu.core_type = #tpu.core_type<tc>} {
    %0 = tpu.iota {dimensions = array<i32: 0>} : vector<32x1xi32>
    %c16_i32 = arith.constant 16 : i32
    %c0_i32 = arith.constant 0 : i32
    %1 = arith.cmpi eq, %c16_i32, %c0_i32 : i32
    %c1_i32 = arith.constant 1 : i32
    %2 = arith.select %1, %c1_i32, %c16_i32 : i32
    %3 = vector.broadcast %2 : i32 to vector<32x1xi32>
    %4 = arith.remsi %0, %3 : vector<32x1xi32>
    %c0_i32_0 = arith.constant 0 : i32
    %5 = vector.broadcast %c0_i32_0 : i32 to vector<32x1xi32>
    %6 = arith.cmpi ne, %4, %5 : vector<32x1xi32>
    %c0_i32_1 = arith.constant 0 : i32
    %7 = vector.broadcast %c0_i32_1 : i32 to vector<32x1xi32>
    %8 = arith.cmpi slt, %4, %7 : vector<32x1xi32>
    %c0_i32_2 = arith.constant 0 : i32
    %9 = arith.cmpi slt, %2, %c0_i32_2 : i32
    %10 = vector.broadcast %9 : i1 to vector<32x1xi1>
    %11 = vector.broadcast %10 : vector<32x1xi1> to vector<32x1xi1>
    %12 = arith.xori %8, %11 : vector<32x1xi1>
    %13 = arith.andi %12, %6 : vector<32x1xi1>
    %14 = vector.broadcast %2 : i32 to vector<32x1xi32>
    %15 = arith.addi %4, %14 : vector<32x1xi32>
    %16 = arith.select %13, %15, %4 : vector<32x1xi1>, vector<32x1xi32>
    %c0 = arith.constant 0 : index
    %c0_3 = arith.constant 0 : index
    %17 = vector.load %arg0[%c0, %c0_3] : memref<32x4xf32, #tpu.memory_space<vmem>>, vector<32x4xf32>
    %cst = arith.constant 0.000000e+00 : f32
    %18 = vector.broadcast %cst : f32 to vector<32x8xf32>
    %cst_4 = arith.constant 0.000000e+00 : f32
    %19 = vector.broadcast %cst_4 : f32 to vector<2x4xf32>
    %20 = vector.extract_strided_slice %17 {offsets = [0, 0], sizes = [30, 4], strides = [1, 1]} : vector<32x4xf32> to vector<30x4xf32>
    %21 = tpu.concatenate %19, %20 in 0 : vector<2x4xf32>, vector<30x4xf32> -> vector<32x4xf32>
    %c2_i32 = arith.constant 2 : i32
    %22 = vector.broadcast %c2_i32 : i32 to vector<32x1xi32>
    %23 = arith.cmpi sge, %16, %22 : vector<32x1xi32>
    %cst_5 = arith.constant 0.000000e+00 : f32
    %24 = vector.shape_cast %23 : vector<32x1xi1> to vector<32x1xi1>
    %25 = vector.broadcast %24 : vector<32x1xi1> to vector<32x4xi1>
    %26 = vector.broadcast %cst_5 : f32 to vector<32x4xf32>
    %27 = arith.select %25, %21, %26 : vector<32x4xi1>, vector<32x4xf32>
    %c0_6 = arith.constant 0 : index
    %c0_7 = arith.constant 0 : index
    %c0_8 = arith.constant 0 : index
    %28 = vector.load %arg2[%c0_6, %c0_7, %c0_8] : memref<3x4x8xf32, #tpu.memory_space<vmem>>, vector<1x4x8xf32>
    %29 = vector.shape_cast %28 : vector<1x4x8xf32> to vector<4x8xf32>
    %cst_9 = arith.constant dense<0.000000e+00> : vector<32x8xf32>
    %30 = tpu.matmul %27, %29, %cst_9 {dimension_numbers = #tpu.dot_dimension_numbers<[1], [0], [0], [1], [0, 0, 1, 1], [], []>} : vector<32x4xf32>, vector<4x8xf32>, vector<32x8xf32> -> vector<32x8xf32>
    %31 = arith.addf %18, %30 : vector<32x8xf32>
    %cst_10 = arith.constant 0.000000e+00 : f32
    %32 = vector.broadcast %cst_10 : f32 to vector<1x4xf32>
    %33 = vector.extract_strided_slice %17 {offsets = [0, 0], sizes = [31, 4], strides = [1, 1]} : vector<32x4xf32> to vector<31x4xf32>
    %34 = tpu.concatenate %32, %33 in 0 : vector<1x4xf32>, vector<31x4xf32> -> vector<32x4xf32>
    %c1_i32_11 = arith.constant 1 : i32
    %35 = vector.broadcast %c1_i32_11 : i32 to vector<32x1xi32>
    %36 = arith.cmpi sge, %16, %35 : vector<32x1xi32>
    %cst_12 = arith.constant 0.000000e+00 : f32
    %37 = vector.shape_cast %36 : vector<32x1xi1> to vector<32x1xi1>
    %38 = vector.broadcast %37 : vector<32x1xi1> to vector<32x4xi1>
    %39 = vector.broadcast %cst_12 : f32 to vector<32x4xf32>
    %40 = arith.select %38, %34, %39 : vector<32x4xi1>, vector<32x4xf32>
    %c1 = arith.constant 1 : index
    %c0_13 = arith.constant 0 : index
    %c0_14 = arith.constant 0 : index
    %41 = vector.load %arg2[%c1, %c0_13, %c0_14] : memref<3x4x8xf32, #tpu.memory_space<vmem>>, vector<1x4x8xf32>
    %42 = vector.shape_cast %41 : vector<1x4x8xf32> to vector<4x8xf32>
    %cst_15 = arith.constant dense<0.000000e+00> : vector<32x8xf32>
    %43 = tpu.matmul %40, %42, %cst_15 {dimension_numbers = #tpu.dot_dimension_numbers<[1], [0], [0], [1], [0, 0, 1, 1], [], []>} : vector<32x4xf32>, vector<4x8xf32>, vector<32x8xf32> -> vector<32x8xf32>
    %44 = arith.addf %31, %43 : vector<32x8xf32>
    %c2 = arith.constant 2 : index
    %c0_16 = arith.constant 0 : index
    %c0_17 = arith.constant 0 : index
    %45 = vector.load %arg2[%c2, %c0_16, %c0_17] : memref<3x4x8xf32, #tpu.memory_space<vmem>>, vector<1x4x8xf32>
    %46 = vector.shape_cast %45 : vector<1x4x8xf32> to vector<4x8xf32>
    %cst_18 = arith.constant dense<0.000000e+00> : vector<32x8xf32>
    %47 = tpu.matmul %17, %46, %cst_18 {dimension_numbers = #tpu.dot_dimension_numbers<[1], [0], [0], [1], [0, 0, 1, 1], [], []>} : vector<32x4xf32>, vector<4x8xf32>, vector<32x8xf32> -> vector<32x8xf32>
    %48 = arith.addf %44, %47 : vector<32x8xf32>
    %c0_19 = arith.constant 0 : index
    %c0_20 = arith.constant 0 : index
    %49 = vector.load %arg3[%c0_19, %c0_20] : memref<1x8xf32, #tpu.memory_space<vmem>>, vector<1x8xf32>
    %50 = vector.broadcast %49 : vector<1x8xf32> to vector<32x8xf32>
    %51 = arith.addf %48, %50 : vector<32x8xf32>
    %cst_21 = arith.constant 0.000000e+00 : f32
    %52 = vector.broadcast %cst_21 : f32 to vector<32x8xf32>
    %53 = arith.maximumf %51, %52 : vector<32x8xf32>
    %cst_22 = arith.constant 0.000000e+00 : f32
    %54 = vector.broadcast %cst_22 : f32 to vector<32x8xf32>
    %cst_23 = arith.constant 0.000000e+00 : f32
    %55 = vector.broadcast %cst_23 : f32 to vector<2x8xf32>
    %56 = vector.extract_strided_slice %53 {offsets = [0, 0], sizes = [30, 8], strides = [1, 1]} : vector<32x8xf32> to vector<30x8xf32>
    %57 = tpu.concatenate %55, %56 in 0 : vector<2x8xf32>, vector<30x8xf32> -> vector<32x8xf32>
    %c2_i32_24 = arith.constant 2 : i32
    %58 = vector.broadcast %c2_i32_24 : i32 to vector<32x1xi32>
    %59 = arith.cmpi sge, %16, %58 : vector<32x1xi32>
    %cst_25 = arith.constant 0.000000e+00 : f32
    %60 = vector.shape_cast %59 : vector<32x1xi1> to vector<32x1xi1>
    %61 = vector.broadcast %60 : vector<32x1xi1> to vector<32x8xi1>
    %62 = vector.broadcast %cst_25 : f32 to vector<32x8xf32>
    %63 = arith.select %61, %57, %62 : vector<32x8xi1>, vector<32x8xf32>
    %c0_26 = arith.constant 0 : index
    %c0_27 = arith.constant 0 : index
    %c0_28 = arith.constant 0 : index
    %64 = vector.load %arg4[%c0_26, %c0_27, %c0_28] : memref<3x8x8xf32, #tpu.memory_space<vmem>>, vector<1x8x8xf32>
    %65 = vector.shape_cast %64 : vector<1x8x8xf32> to vector<8x8xf32>
    %cst_29 = arith.constant dense<0.000000e+00> : vector<32x8xf32>
    %66 = tpu.matmul %63, %65, %cst_29 {dimension_numbers = #tpu.dot_dimension_numbers<[1], [0], [0], [1], [0, 0, 1, 1], [], []>} : vector<32x8xf32>, vector<8x8xf32>, vector<32x8xf32> -> vector<32x8xf32>
    %67 = arith.addf %54, %66 : vector<32x8xf32>
    %cst_30 = arith.constant 0.000000e+00 : f32
    %68 = vector.broadcast %cst_30 : f32 to vector<1x8xf32>
    %69 = vector.extract_strided_slice %53 {offsets = [0, 0], sizes = [31, 8], strides = [1, 1]} : vector<32x8xf32> to vector<31x8xf32>
    %70 = tpu.concatenate %68, %69 in 0 : vector<1x8xf32>, vector<31x8xf32> -> vector<32x8xf32>
    %c1_i32_31 = arith.constant 1 : i32
    %71 = vector.broadcast %c1_i32_31 : i32 to vector<32x1xi32>
    %72 = arith.cmpi sge, %16, %71 : vector<32x1xi32>
    %cst_32 = arith.constant 0.000000e+00 : f32
    %73 = vector.shape_cast %72 : vector<32x1xi1> to vector<32x1xi1>
    %74 = vector.broadcast %73 : vector<32x1xi1> to vector<32x8xi1>
    %75 = vector.broadcast %cst_32 : f32 to vector<32x8xf32>
    %76 = arith.select %74, %70, %75 : vector<32x8xi1>, vector<32x8xf32>
    %c1_33 = arith.constant 1 : index
    %c0_34 = arith.constant 0 : index
    %c0_35 = arith.constant 0 : index
    %77 = vector.load %arg4[%c1_33, %c0_34, %c0_35] : memref<3x8x8xf32, #tpu.memory_space<vmem>>, vector<1x8x8xf32>
    %78 = vector.shape_cast %77 : vector<1x8x8xf32> to vector<8x8xf32>
    %cst_36 = arith.constant dense<0.000000e+00> : vector<32x8xf32>
    %79 = tpu.matmul %76, %78, %cst_36 {dimension_numbers = #tpu.dot_dimension_numbers<[1], [0], [0], [1], [0, 0, 1, 1], [], []>} : vector<32x8xf32>, vector<8x8xf32>, vector<32x8xf32> -> vector<32x8xf32>
    %80 = arith.addf %67, %79 : vector<32x8xf32>
    %c2_37 = arith.constant 2 : index
    %c0_38 = arith.constant 0 : index
    %c0_39 = arith.constant 0 : index
    %81 = vector.load %arg4[%c2_37, %c0_38, %c0_39] : memref<3x8x8xf32, #tpu.memory_space<vmem>>, vector<1x8x8xf32>
    %82 = vector.shape_cast %81 : vector<1x8x8xf32> to vector<8x8xf32>
    %cst_40 = arith.constant dense<0.000000e+00> : vector<32x8xf32>
    %83 = tpu.matmul %53, %82, %cst_40 {dimension_numbers = #tpu.dot_dimension_numbers<[1], [0], [0], [1], [0, 0, 1, 1], [], []>} : vector<32x8xf32>, vector<8x8xf32>, vector<32x8xf32> -> vector<32x8xf32>
    %84 = arith.addf %80, %83 : vector<32x8xf32>
    %c0_41 = arith.constant 0 : index
    %c0_42 = arith.constant 0 : index
    %85 = vector.load %arg5[%c0_41, %c0_42] : memref<1x8xf32, #tpu.memory_space<vmem>>, vector<1x8xf32>
    %86 = vector.broadcast %85 : vector<1x8xf32> to vector<32x8xf32>
    %87 = arith.addf %84, %86 : vector<32x8xf32>
    %cst_43 = arith.constant 0.000000e+00 : f32
    %88 = vector.broadcast %cst_43 : f32 to vector<32x8xf32>
    %89 = arith.maximumf %87, %88 : vector<32x8xf32>
    %c0_44 = arith.constant 0 : index
    %c0_45 = arith.constant 0 : index
    %90 = vector.load %arg6[%c0_44, %c0_45] : memref<4x8xf32, #tpu.memory_space<vmem>>, vector<4x8xf32>
    %cst_46 = arith.constant dense<0.000000e+00> : vector<32x8xf32>
    %91 = tpu.matmul %17, %90, %cst_46 {dimension_numbers = #tpu.dot_dimension_numbers<[1], [0], [0], [1], [0, 0, 1, 1], [], []>} : vector<32x4xf32>, vector<4x8xf32>, vector<32x8xf32> -> vector<32x8xf32>
    %c0_47 = arith.constant 0 : index
    %c0_48 = arith.constant 0 : index
    %92 = vector.load %arg7[%c0_47, %c0_48] : memref<1x8xf32, #tpu.memory_space<vmem>>, vector<1x8xf32>
    %93 = vector.broadcast %92 : vector<1x8xf32> to vector<32x8xf32>
    %94 = arith.addf %91, %93 : vector<32x8xf32>
    %95 = arith.addf %89, %94 : vector<32x8xf32>
    %cst_49 = arith.constant 0.000000e+00 : f32
    %96 = vector.broadcast %cst_49 : f32 to vector<32x8xf32>
    %97 = arith.maximumf %95, %96 : vector<32x8xf32>
    %cst_50 = arith.constant 0.000000e+00 : f32
    %98 = vector.broadcast %cst_50 : f32 to vector<32x8xf32>
    %cst_51 = arith.constant 0.000000e+00 : f32
    %99 = vector.broadcast %cst_51 : f32 to vector<4x8xf32>
    %100 = vector.extract_strided_slice %97 {offsets = [0, 0], sizes = [28, 8], strides = [1, 1]} : vector<32x8xf32> to vector<28x8xf32>
    %101 = tpu.concatenate %99, %100 in 0 : vector<4x8xf32>, vector<28x8xf32> -> vector<32x8xf32>
    %c4_i32 = arith.constant 4 : i32
    %102 = vector.broadcast %c4_i32 : i32 to vector<32x1xi32>
    %103 = arith.cmpi sge, %16, %102 : vector<32x1xi32>
    %cst_52 = arith.constant 0.000000e+00 : f32
    %104 = vector.shape_cast %103 : vector<32x1xi1> to vector<32x1xi1>
    %105 = vector.broadcast %104 : vector<32x1xi1> to vector<32x8xi1>
    %106 = vector.broadcast %cst_52 : f32 to vector<32x8xf32>
    %107 = arith.select %105, %101, %106 : vector<32x8xi1>, vector<32x8xf32>
    %c0_53 = arith.constant 0 : index
    %c0_54 = arith.constant 0 : index
    %c0_55 = arith.constant 0 : index
    %108 = vector.load %arg8[%c0_53, %c0_54, %c0_55] : memref<3x8x8xf32, #tpu.memory_space<vmem>>, vector<1x8x8xf32>
    %109 = vector.shape_cast %108 : vector<1x8x8xf32> to vector<8x8xf32>
    %cst_56 = arith.constant dense<0.000000e+00> : vector<32x8xf32>
    %110 = tpu.matmul %107, %109, %cst_56 {dimension_numbers = #tpu.dot_dimension_numbers<[1], [0], [0], [1], [0, 0, 1, 1], [], []>} : vector<32x8xf32>, vector<8x8xf32>, vector<32x8xf32> -> vector<32x8xf32>
    %111 = arith.addf %98, %110 : vector<32x8xf32>
    %cst_57 = arith.constant 0.000000e+00 : f32
    %112 = vector.broadcast %cst_57 : f32 to vector<2x8xf32>
    %113 = vector.extract_strided_slice %97 {offsets = [0, 0], sizes = [30, 8], strides = [1, 1]} : vector<32x8xf32> to vector<30x8xf32>
    %114 = tpu.concatenate %112, %113 in 0 : vector<2x8xf32>, vector<30x8xf32> -> vector<32x8xf32>
    %c2_i32_58 = arith.constant 2 : i32
    %115 = vector.broadcast %c2_i32_58 : i32 to vector<32x1xi32>
    %116 = arith.cmpi sge, %16, %115 : vector<32x1xi32>
    %cst_59 = arith.constant 0.000000e+00 : f32
    %117 = vector.shape_cast %116 : vector<32x1xi1> to vector<32x1xi1>
    %118 = vector.broadcast %117 : vector<32x1xi1> to vector<32x8xi1>
    %119 = vector.broadcast %cst_59 : f32 to vector<32x8xf32>
    %120 = arith.select %118, %114, %119 : vector<32x8xi1>, vector<32x8xf32>
    %c1_60 = arith.constant 1 : index
    %c0_61 = arith.constant 0 : index
    %c0_62 = arith.constant 0 : index
    %121 = vector.load %arg8[%c1_60, %c0_61, %c0_62] : memref<3x8x8xf32, #tpu.memory_space<vmem>>, vector<1x8x8xf32>
    %122 = vector.shape_cast %121 : vector<1x8x8xf32> to vector<8x8xf32>
    %cst_63 = arith.constant dense<0.000000e+00> : vector<32x8xf32>
    %123 = tpu.matmul %120, %122, %cst_63 {dimension_numbers = #tpu.dot_dimension_numbers<[1], [0], [0], [1], [0, 0, 1, 1], [], []>} : vector<32x8xf32>, vector<8x8xf32>, vector<32x8xf32> -> vector<32x8xf32>
    %124 = arith.addf %111, %123 : vector<32x8xf32>
    %c2_64 = arith.constant 2 : index
    %c0_65 = arith.constant 0 : index
    %c0_66 = arith.constant 0 : index
    %125 = vector.load %arg8[%c2_64, %c0_65, %c0_66] : memref<3x8x8xf32, #tpu.memory_space<vmem>>, vector<1x8x8xf32>
    %126 = vector.shape_cast %125 : vector<1x8x8xf32> to vector<8x8xf32>
    %cst_67 = arith.constant dense<0.000000e+00> : vector<32x8xf32>
    %127 = tpu.matmul %97, %126, %cst_67 {dimension_numbers = #tpu.dot_dimension_numbers<[1], [0], [0], [1], [0, 0, 1, 1], [], []>} : vector<32x8xf32>, vector<8x8xf32>, vector<32x8xf32> -> vector<32x8xf32>
    %128 = arith.addf %124, %127 : vector<32x8xf32>
    %c0_68 = arith.constant 0 : index
    %c0_69 = arith.constant 0 : index
    %129 = vector.load %arg9[%c0_68, %c0_69] : memref<1x8xf32, #tpu.memory_space<vmem>>, vector<1x8xf32>
    %130 = vector.broadcast %129 : vector<1x8xf32> to vector<32x8xf32>
    %131 = arith.addf %128, %130 : vector<32x8xf32>
    %cst_70 = arith.constant 0.000000e+00 : f32
    %132 = vector.broadcast %cst_70 : f32 to vector<32x8xf32>
    %133 = arith.maximumf %131, %132 : vector<32x8xf32>
    %cst_71 = arith.constant 0.000000e+00 : f32
    %134 = vector.broadcast %cst_71 : f32 to vector<32x8xf32>
    %cst_72 = arith.constant 0.000000e+00 : f32
    %135 = vector.broadcast %cst_72 : f32 to vector<4x8xf32>
    %136 = vector.extract_strided_slice %133 {offsets = [0, 0], sizes = [28, 8], strides = [1, 1]} : vector<32x8xf32> to vector<28x8xf32>
    %137 = tpu.concatenate %135, %136 in 0 : vector<4x8xf32>, vector<28x8xf32> -> vector<32x8xf32>
    %c4_i32_73 = arith.constant 4 : i32
    %138 = vector.broadcast %c4_i32_73 : i32 to vector<32x1xi32>
    %139 = arith.cmpi sge, %16, %138 : vector<32x1xi32>
    %cst_74 = arith.constant 0.000000e+00 : f32
    %140 = vector.shape_cast %139 : vector<32x1xi1> to vector<32x1xi1>
    %141 = vector.broadcast %140 : vector<32x1xi1> to vector<32x8xi1>
    %142 = vector.broadcast %cst_74 : f32 to vector<32x8xf32>
    %143 = arith.select %141, %137, %142 : vector<32x8xi1>, vector<32x8xf32>
    %c0_75 = arith.constant 0 : index
    %c0_76 = arith.constant 0 : index
    %c0_77 = arith.constant 0 : index
    %144 = vector.load %arg10[%c0_75, %c0_76, %c0_77] : memref<3x8x8xf32, #tpu.memory_space<vmem>>, vector<1x8x8xf32>
    %145 = vector.shape_cast %144 : vector<1x8x8xf32> to vector<8x8xf32>
    %cst_78 = arith.constant dense<0.000000e+00> : vector<32x8xf32>
    %146 = tpu.matmul %143, %145, %cst_78 {dimension_numbers = #tpu.dot_dimension_numbers<[1], [0], [0], [1], [0, 0, 1, 1], [], []>} : vector<32x8xf32>, vector<8x8xf32>, vector<32x8xf32> -> vector<32x8xf32>
    %147 = arith.addf %134, %146 : vector<32x8xf32>
    %cst_79 = arith.constant 0.000000e+00 : f32
    %148 = vector.broadcast %cst_79 : f32 to vector<2x8xf32>
    %149 = vector.extract_strided_slice %133 {offsets = [0, 0], sizes = [30, 8], strides = [1, 1]} : vector<32x8xf32> to vector<30x8xf32>
    %150 = tpu.concatenate %148, %149 in 0 : vector<2x8xf32>, vector<30x8xf32> -> vector<32x8xf32>
    %c2_i32_80 = arith.constant 2 : i32
    %151 = vector.broadcast %c2_i32_80 : i32 to vector<32x1xi32>
    %152 = arith.cmpi sge, %16, %151 : vector<32x1xi32>
    %cst_81 = arith.constant 0.000000e+00 : f32
    %153 = vector.shape_cast %152 : vector<32x1xi1> to vector<32x1xi1>
    %154 = vector.broadcast %153 : vector<32x1xi1> to vector<32x8xi1>
    %155 = vector.broadcast %cst_81 : f32 to vector<32x8xf32>
    %156 = arith.select %154, %150, %155 : vector<32x8xi1>, vector<32x8xf32>
    %c1_82 = arith.constant 1 : index
    %c0_83 = arith.constant 0 : index
    %c0_84 = arith.constant 0 : index
    %157 = vector.load %arg10[%c1_82, %c0_83, %c0_84] : memref<3x8x8xf32, #tpu.memory_space<vmem>>, vector<1x8x8xf32>
    %158 = vector.shape_cast %157 : vector<1x8x8xf32> to vector<8x8xf32>
    %cst_85 = arith.constant dense<0.000000e+00> : vector<32x8xf32>
    %159 = tpu.matmul %156, %158, %cst_85 {dimension_numbers = #tpu.dot_dimension_numbers<[1], [0], [0], [1], [0, 0, 1, 1], [], []>} : vector<32x8xf32>, vector<8x8xf32>, vector<32x8xf32> -> vector<32x8xf32>
    %160 = arith.addf %147, %159 : vector<32x8xf32>
    %c2_86 = arith.constant 2 : index
    %c0_87 = arith.constant 0 : index
    %c0_88 = arith.constant 0 : index
    %161 = vector.load %arg10[%c2_86, %c0_87, %c0_88] : memref<3x8x8xf32, #tpu.memory_space<vmem>>, vector<1x8x8xf32>
    %162 = vector.shape_cast %161 : vector<1x8x8xf32> to vector<8x8xf32>
    %cst_89 = arith.constant dense<0.000000e+00> : vector<32x8xf32>
    %163 = tpu.matmul %133, %162, %cst_89 {dimension_numbers = #tpu.dot_dimension_numbers<[1], [0], [0], [1], [0, 0, 1, 1], [], []>} : vector<32x8xf32>, vector<8x8xf32>, vector<32x8xf32> -> vector<32x8xf32>
    %164 = arith.addf %160, %163 : vector<32x8xf32>
    %c0_90 = arith.constant 0 : index
    %c0_91 = arith.constant 0 : index
    %165 = vector.load %arg11[%c0_90, %c0_91] : memref<1x8xf32, #tpu.memory_space<vmem>>, vector<1x8xf32>
    %166 = vector.broadcast %165 : vector<1x8xf32> to vector<32x8xf32>
    %167 = arith.addf %164, %166 : vector<32x8xf32>
    %cst_92 = arith.constant 0.000000e+00 : f32
    %168 = vector.broadcast %cst_92 : f32 to vector<32x8xf32>
    %169 = arith.maximumf %167, %168 : vector<32x8xf32>
    %170 = arith.addf %169, %97 : vector<32x8xf32>
    %cst_93 = arith.constant 0.000000e+00 : f32
    %171 = vector.broadcast %cst_93 : f32 to vector<32x8xf32>
    %172 = arith.maximumf %170, %171 : vector<32x8xf32>
    %c0_94 = arith.constant 0 : index
    %c0_95 = arith.constant 0 : index
    %173 = vector.load %arg17[%c0_94, %c0_95] : memref<32x8xf32, #tpu.memory_space<vmem>>, vector<32x8xf32>
    tpu.vector_store %arg17[%c0_94, %c0_95], %172 {strides = array<i32>} : memref<32x8xf32, #tpu.memory_space<vmem>>, vector<32x8xf32>,
    %c0_96 = arith.constant 0 : index
    %c0_97 = arith.constant 0 : index
    %174 = tpu.strided_load %arg17[%c0_96, %c0_97] {strides = array<i32: 16, 1>} : memref<32x8xf32, #tpu.memory_space<vmem>>, vector<2x8xf32>
    %c0_98 = arith.constant 0 : index
    %c0_99 = arith.constant 0 : index
    %175 = vector.load %arg18[%c0_98, %c0_99] : memref<2x128xf32, #tpu.memory_space<vmem>>, vector<2x8xf32>
    tpu.vector_store %arg18[%c0_98, %c0_99], %174 {strides = array<i32>} : memref<2x128xf32, #tpu.memory_space<vmem>>, vector<2x8xf32>,
    %c1_100 = arith.constant 1 : index
    %c0_101 = arith.constant 0 : index
    %176 = tpu.strided_load %arg17[%c1_100, %c0_101] {strides = array<i32: 16, 1>} : memref<32x8xf32, #tpu.memory_space<vmem>>, vector<2x8xf32>
    %c0_102 = arith.constant 0 : index
    %c8 = arith.constant 8 : index
    %177 = vector.load %arg18[%c0_102, %c8] : memref<2x128xf32, #tpu.memory_space<vmem>>, vector<2x8xf32>
    tpu.vector_store %arg18[%c0_102, %c8], %176 {strides = array<i32>} : memref<2x128xf32, #tpu.memory_space<vmem>>, vector<2x8xf32>,
    %c2_103 = arith.constant 2 : index
    %c0_104 = arith.constant 0 : index
    %178 = tpu.strided_load %arg17[%c2_103, %c0_104] {strides = array<i32: 16, 1>} : memref<32x8xf32, #tpu.memory_space<vmem>>, vector<2x8xf32>
    %c0_105 = arith.constant 0 : index
    %c16 = arith.constant 16 : index
    %179 = vector.load %arg18[%c0_105, %c16] : memref<2x128xf32, #tpu.memory_space<vmem>>, vector<2x8xf32>
    tpu.vector_store %arg18[%c0_105, %c16], %178 {strides = array<i32>} : memref<2x128xf32, #tpu.memory_space<vmem>>, vector<2x8xf32>,
    %c3 = arith.constant 3 : index
    %c0_106 = arith.constant 0 : index
    %180 = tpu.strided_load %arg17[%c3, %c0_106] {strides = array<i32: 16, 1>} : memref<32x8xf32, #tpu.memory_space<vmem>>, vector<2x8xf32>
    %c0_107 = arith.constant 0 : index
    %c24 = arith.constant 24 : index
    %181 = vector.load %arg18[%c0_107, %c24] : memref<2x128xf32, #tpu.memory_space<vmem>>, vector<2x8xf32>
    tpu.vector_store %arg18[%c0_107, %c24], %180 {strides = array<i32>} : memref<2x128xf32, #tpu.memory_space<vmem>>, vector<2x8xf32>,
    %c4 = arith.constant 4 : index
    %c0_108 = arith.constant 0 : index
    %182 = tpu.strided_load %arg17[%c4, %c0_108] {strides = array<i32: 16, 1>} : memref<32x8xf32, #tpu.memory_space<vmem>>, vector<2x8xf32>
    %c0_109 = arith.constant 0 : index
    %c32 = arith.constant 32 : index
    %183 = vector.load %arg18[%c0_109, %c32] : memref<2x128xf32, #tpu.memory_space<vmem>>, vector<2x8xf32>
    tpu.vector_store %arg18[%c0_109, %c32], %182 {strides = array<i32>} : memref<2x128xf32, #tpu.memory_space<vmem>>, vector<2x8xf32>,
    %c5 = arith.constant 5 : index
    %c0_110 = arith.constant 0 : index
    %184 = tpu.strided_load %arg17[%c5, %c0_110] {strides = array<i32: 16, 1>} : memref<32x8xf32, #tpu.memory_space<vmem>>, vector<2x8xf32>
    %c0_111 = arith.constant 0 : index
    %c40 = arith.constant 40 : index
    %185 = vector.load %arg18[%c0_111, %c40] : memref<2x128xf32, #tpu.memory_space<vmem>>, vector<2x8xf32>
    tpu.vector_store %arg18[%c0_111, %c40], %184 {strides = array<i32>} : memref<2x128xf32, #tpu.memory_space<vmem>>, vector<2x8xf32>,
    %c6 = arith.constant 6 : index
    %c0_112 = arith.constant 0 : index
    %186 = tpu.strided_load %arg17[%c6, %c0_112] {strides = array<i32: 16, 1>} : memref<32x8xf32, #tpu.memory_space<vmem>>, vector<2x8xf32>
    %c0_113 = arith.constant 0 : index
    %c48 = arith.constant 48 : index
    %187 = vector.load %arg18[%c0_113, %c48] : memref<2x128xf32, #tpu.memory_space<vmem>>, vector<2x8xf32>
    tpu.vector_store %arg18[%c0_113, %c48], %186 {strides = array<i32>} : memref<2x128xf32, #tpu.memory_space<vmem>>, vector<2x8xf32>,
    %c7 = arith.constant 7 : index
    %c0_114 = arith.constant 0 : index
    %188 = tpu.strided_load %arg17[%c7, %c0_114] {strides = array<i32: 16, 1>} : memref<32x8xf32, #tpu.memory_space<vmem>>, vector<2x8xf32>
    %c0_115 = arith.constant 0 : index
    %c56 = arith.constant 56 : index
    %189 = vector.load %arg18[%c0_115, %c56] : memref<2x128xf32, #tpu.memory_space<vmem>>, vector<2x8xf32>
    tpu.vector_store %arg18[%c0_115, %c56], %188 {strides = array<i32>} : memref<2x128xf32, #tpu.memory_space<vmem>>, vector<2x8xf32>,
    %c8_116 = arith.constant 8 : index
    %c0_117 = arith.constant 0 : index
    %190 = tpu.strided_load %arg17[%c8_116, %c0_117] {strides = array<i32: 16, 1>} : memref<32x8xf32, #tpu.memory_space<vmem>>, vector<2x8xf32>
    %c0_118 = arith.constant 0 : index
    %c64 = arith.constant 64 : index
    %191 = vector.load %arg18[%c0_118, %c64] : memref<2x128xf32, #tpu.memory_space<vmem>>, vector<2x8xf32>
    tpu.vector_store %arg18[%c0_118, %c64], %190 {strides = array<i32>} : memref<2x128xf32, #tpu.memory_space<vmem>>, vector<2x8xf32>,
    %c9 = arith.constant 9 : index
    %c0_119 = arith.constant 0 : index
    %192 = tpu.strided_load %arg17[%c9, %c0_119] {strides = array<i32: 16, 1>} : memref<32x8xf32, #tpu.memory_space<vmem>>, vector<2x8xf32>
    %c0_120 = arith.constant 0 : index
    %c72 = arith.constant 72 : index
    %193 = vector.load %arg18[%c0_120, %c72] : memref<2x128xf32, #tpu.memory_space<vmem>>, vector<2x8xf32>
    tpu.vector_store %arg18[%c0_120, %c72], %192 {strides = array<i32>} : memref<2x128xf32, #tpu.memory_space<vmem>>, vector<2x8xf32>,
    %c10 = arith.constant 10 : index
    %c0_121 = arith.constant 0 : index
    %194 = tpu.strided_load %arg17[%c10, %c0_121] {strides = array<i32: 16, 1>} : memref<32x8xf32, #tpu.memory_space<vmem>>, vector<2x8xf32>
    %c0_122 = arith.constant 0 : index
    %c80 = arith.constant 80 : index
    %195 = vector.load %arg18[%c0_122, %c80] : memref<2x128xf32, #tpu.memory_space<vmem>>, vector<2x8xf32>
    tpu.vector_store %arg18[%c0_122, %c80], %194 {strides = array<i32>} : memref<2x128xf32, #tpu.memory_space<vmem>>, vector<2x8xf32>,
    %c11 = arith.constant 11 : index
    %c0_123 = arith.constant 0 : index
    %196 = tpu.strided_load %arg17[%c11, %c0_123] {strides = array<i32: 16, 1>} : memref<32x8xf32, #tpu.memory_space<vmem>>, vector<2x8xf32>
    %c0_124 = arith.constant 0 : index
    %c88 = arith.constant 88 : index
    %197 = vector.load %arg18[%c0_124, %c88] : memref<2x128xf32, #tpu.memory_space<vmem>>, vector<2x8xf32>
    tpu.vector_store %arg18[%c0_124, %c88], %196 {strides = array<i32>} : memref<2x128xf32, #tpu.memory_space<vmem>>, vector<2x8xf32>,
    %c12 = arith.constant 12 : index
    %c0_125 = arith.constant 0 : index
    %198 = tpu.strided_load %arg17[%c12, %c0_125] {strides = array<i32: 16, 1>} : memref<32x8xf32, #tpu.memory_space<vmem>>, vector<2x8xf32>
    %c0_126 = arith.constant 0 : index
    %c96 = arith.constant 96 : index
    %199 = vector.load %arg18[%c0_126, %c96] : memref<2x128xf32, #tpu.memory_space<vmem>>, vector<2x8xf32>
    tpu.vector_store %arg18[%c0_126, %c96], %198 {strides = array<i32>} : memref<2x128xf32, #tpu.memory_space<vmem>>, vector<2x8xf32>,
    %c13 = arith.constant 13 : index
    %c0_127 = arith.constant 0 : index
    %200 = tpu.strided_load %arg17[%c13, %c0_127] {strides = array<i32: 16, 1>} : memref<32x8xf32, #tpu.memory_space<vmem>>, vector<2x8xf32>
    %c0_128 = arith.constant 0 : index
    %c104 = arith.constant 104 : index
    %201 = vector.load %arg18[%c0_128, %c104] : memref<2x128xf32, #tpu.memory_space<vmem>>, vector<2x8xf32>
    tpu.vector_store %arg18[%c0_128, %c104], %200 {strides = array<i32>} : memref<2x128xf32, #tpu.memory_space<vmem>>, vector<2x8xf32>,
    %c14 = arith.constant 14 : index
    %c0_129 = arith.constant 0 : index
    %202 = tpu.strided_load %arg17[%c14, %c0_129] {strides = array<i32: 16, 1>} : memref<32x8xf32, #tpu.memory_space<vmem>>, vector<2x8xf32>
    %c0_130 = arith.constant 0 : index
    %c112 = arith.constant 112 : index
    %203 = vector.load %arg18[%c0_130, %c112] : memref<2x128xf32, #tpu.memory_space<vmem>>, vector<2x8xf32>
    tpu.vector_store %arg18[%c0_130, %c112], %202 {strides = array<i32>} : memref<2x128xf32, #tpu.memory_space<vmem>>, vector<2x8xf32>,
    %c15 = arith.constant 15 : index
    %c0_131 = arith.constant 0 : index
    %204 = tpu.strided_load %arg17[%c15, %c0_131] {strides = array<i32: 16, 1>} : memref<32x8xf32, #tpu.memory_space<vmem>>, vector<2x8xf32>
    %c0_132 = arith.constant 0 : index
    %c120 = arith.constant 120 : index
    %205 = vector.load %arg18[%c0_132, %c120] : memref<2x128xf32, #tpu.memory_space<vmem>>, vector<2x8xf32>
    tpu.vector_store %arg18[%c0_132, %c120], %204 {strides = array<i32>} : memref<2x128xf32, #tpu.memory_space<vmem>>, vector<2x8xf32>,
    %c0_133 = arith.constant 0 : index
    %c0_134 = arith.constant 0 : index
    %206 = vector.load %arg18[%c0_133, %c0_134] : memref<2x128xf32, #tpu.memory_space<vmem>>, vector<2x128xf32>
    %c0_135 = arith.constant 0 : index
    %c0_136 = arith.constant 0 : index
    %207 = vector.load %arg1[%c0_135, %c0_136] : memref<2x128xf32, #tpu.memory_space<vmem>>, vector<2x128xf32>
    %208 = arith.addf %206, %207 : vector<2x128xf32>
    %c0_137 = arith.constant 0 : index
    %c0_138 = arith.constant 0 : index
    %209 = vector.load %arg12[%c0_137, %c0_138] : memref<128x64xf32, #tpu.memory_space<vmem>>, vector<128x64xf32>
    %cst_139 = arith.constant dense<0.000000e+00> : vector<2x64xf32>
    %210 = tpu.matmul %208, %209, %cst_139 {dimension_numbers = #tpu.dot_dimension_numbers<[1], [0], [0], [1], [0, 0, 1, 1], [], []>} : vector<2x128xf32>, vector<128x64xf32>, vector<2x64xf32> -> vector<2x64xf32>
    %c0_140 = arith.constant 0 : index
    %c0_141 = arith.constant 0 : index
    %211 = vector.load %arg13[%c0_140, %c0_141] : memref<1x64xf32, #tpu.memory_space<vmem>>, vector<1x64xf32>
    %212 = vector.broadcast %211 : vector<1x64xf32> to vector<2x64xf32>
    %213 = arith.addf %210, %212 : vector<2x64xf32>
    %cst_142 = arith.constant 0.000000e+00 : f32
    %214 = vector.broadcast %cst_142 : f32 to vector<2x64xf32>
    %215 = arith.maximumf %213, %214 : vector<2x64xf32>
    %c0_143 = arith.constant 0 : index
    %c0_144 = arith.constant 0 : index
    %216 = vector.load %arg14[%c0_143, %c0_144] : memref<64x128xf32, #tpu.memory_space<vmem>>, vector<64x128xf32>
    %cst_145 = arith.constant dense<0.000000e+00> : vector<2x128xf32>
    %217 = tpu.matmul %215, %216, %cst_145 {dimension_numbers = #tpu.dot_dimension_numbers<[1], [0], [0], [1], [0, 0, 1, 1], [], []>} : vector<2x64xf32>, vector<64x128xf32>, vector<2x128xf32> -> vector<2x128xf32>
    %c0_146 = arith.constant 0 : index
    %c0_147 = arith.constant 0 : index
    %218 = vector.load %arg15[%c0_146, %c0_147] : memref<1x128xf32, #tpu.memory_space<vmem>>, vector<1x128xf32>
    %219 = vector.broadcast %218 : vector<1x128xf32> to vector<2x128xf32>
    %220 = arith.addf %217, %219 : vector<2x128xf32>
    %c0_148 = arith.constant 0 : index
    %c0_149 = arith.constant 0 : index
    %221 = vector.load %arg16[%c0_148, %c0_149] : memref<2x128xf32, #tpu.memory_space<vmem>>, vector<2x128xf32>
    tpu.vector_store %arg16[%c0_148, %c0_149], %220 {strides = array<i32>} : memref<2x128xf32, #tpu.memory_space<vmem>>, vector<2x128xf32>,
    return
  }
}

</mosaic_0001>

<bundles_post_ra>
// kernel: _lambda_.1
= control target key start
LH: loop header
LB: loop body
LE: loop exit
PB: predicated region body
PF: predicated region fallthrough
CT: control target
= control target key end

     0   :  { %s3120_s0 = inlined_call_operand.vmem [shape: f32[32,4], index: 0, kind: input, shape index: {}]   ;;  %s3121_s1 = inlined_call_operand.vmem [shape: f32[2,128], index: 1, kind: input, shape index: {}]   ;;  %s3122_s2 = inlined_call_operand.hbm [shape: f32[3,4,8], index: 2, kind: input, shape index: {}]   ;;  %s3123_s3 = inlined_call_operand.vmem [shape: f32[1,8], index: 3, kind: input, shape index: {}]   ;;  %s3124_s4 = inlined_call_operand.hbm [shape: f32[3,8,8], index: 4, kind: input, shape index: {}]   ;;  %s3125_s5 = inlined_call_operand.vmem [shape: f32[1,8], index: 5, kind: input, shape index: {}]   ;;  %s3126_s6 = inlined_call_operand.hbm [shape: f32[4,8], index: 6, kind: input, shape index: {}]   ;;  %s3127_s7 = inlined_call_operand.hbm [shape: f32[1,8], index: 7, kind: input, shape index: {}]   ;;  %s3128_s8 = inlined_call_operand.hbm [shape: f32[3,8,8], index: 8, kind: input, shape index: {}]   ;;  %s3129_s9 = inlined_call_operand.hbm [shape: f32[1,8], index: 9, kind: input, shape index: {}]   ;;  %s3130_s10 = inlined_call_operand.vmem [shape: f32[3,8,8], index: 10, kind: input, shape index: {}]   ;;  %s3131_s11 = inlined_call_operand.hbm [shape: f32[1,8], index: 11, kind: input, shape index: {}]   ;;  %s3132_s12 = inlined_call_operand.vmem [shape: f32[128,64], index: 12, kind: input, shape index: {}]   ;;  %s3133_s13 = inlined_call_operand.hbm [shape: f32[1,64], index: 13, kind: input, shape index: {}]   ;;  %s3134_s14 = inlined_call_operand.hbm [shape: f32[64,128], index: 14, kind: input, shape index: {}]   ;;  %s3135_s15 = inlined_call_operand.vmem [shape: f32[1,128], index: 15, kind: input, shape index: {}]   ;;  %s3136_s16 = inlined_call_operand.hbm [shape: f32[2,128], index: 16, kind: output, shape index: {}]  }
   0x1   :  { %3138 = sst [smem:[#allocation26_spill]] %s3120_s0 }
   0x2   :  { %21 = vsyncpa [#allocation5], 0 }
   0x3   :  { %22 = vsyncpa [#allocation8], 0 }
   0x4   :  { %23 = vsyncpa [#allocation11], 0 }
   0x5   :  { %24 = vsyncpa [#allocation14], 0 }
   0x6   :  { %25 = vsyncpa [#allocation17], 0 }
   0x7   :  { %26 = vsyncpa [#allocation6], 0  ;;  %s2664_s21 = smov [#allocation7]  }
   0x8   :  { %s50_s22 = sshll.u32 %s2664_s21, 4  ;;  %s51_s22 = int_to_ptr.vmem [resolvable:$true] %s50_s22 }
   0x9   :  { %s2460_s23 = scalar_lea.vmem %s51_s22, 384  ;;  %p2465_p1 = scmp.lt.s32.totalorder %s51_s22, %s51_s22 }
   0xa   :  { %p2461_p0 = scmp.ne.s32.totalorder %s51_s22, %s2460_s23  ;;  %p2466_p2 = scmp.lt.s32.totalorder %s2460_s23, %s2460_s23 }
   0xc   :  { %p2467_p3 = por %p2466_p2, %p2465_p1 }
   0xe   :  { %p2468_p4 = pnand %p2467_p3, %p2461_p0 }
  0x10   :  { %2471 = shalt.err (!%p2468_p4)
}
  0x11   :  { %s2665_s24 = smov 128   ;;  %s2666_s25 = smov 8  }
  0x12   :  { %56 = dma.hbm_to_vmem [thread:$0]  %s3124_s4, 384, %s51_s22, [#allocation8], %s2665_s24, %s2665_s24, %s2666_s25  }
  0x13   :  { %s2667_s28 = smov [#allocation10]   ;;  %s2668_s30 = smov [#allocation13]  }
  0x14   :  { %s75_s29 = sshll.u32 %s2667_s28, 4  ;;  %s97_s0 = sshll.u32 %s2668_s30, 4  ;;  %s76_s29 = int_to_ptr.vmem [resolvable:$true] %s75_s29  ;;  %s98_s0 = int_to_ptr.vmem [resolvable:$true] %s97_s0 }
  0x15   :  { %s2480_s17 = scalar_lea.vmem %s76_s29, 16  ;;  %s2484_s18 = scalar_lea.vmem %s76_s29, 32 }
  0x16   :  { %p2481_p5 = scmp.ne.s32.totalorder %s76_s29, %s2480_s17  ;;  %p2485_p6 = scmp.lt.s32.totalorder %s76_s29, %s76_s29 }
  0x17   :  { %p2486_p7 = scmp.lt.s32.totalorder %s2484_s18, %s2480_s17 }
  0x19   :  { %p2487_p8 = por %p2486_p7, %p2485_p6 }
  0x1b   :  { %p2488_p9 = pnand %p2487_p8, %p2481_p5 }
  0x1d   :  { %2491 = shalt.err (!%p2488_p9)
}
  0x1e   :  { %78 = dma.hbm_to_vmem [thread:$0]  %s3127_s7, 16, %s76_s29, [#allocation11]  }
  0x1f   :  { %s2500_s21 = scalar_lea.vmem %s98_s0, 16  ;;  %s2504_s4 = scalar_lea.vmem %s98_s0, 32 }
  0x20   :  { %p2501_p10 = scmp.ne.s32.totalorder %s98_s0, %s2500_s21  ;;  %p2505_p11 = scmp.lt.s32.totalorder %s98_s0, %s98_s0 }
  0x21   :  { %p2506_p12 = scmp.lt.s32.totalorder %s2504_s4, %s2500_s21 }
  0x23   :  { %p2507_p13 = por %p2506_p12, %p2505_p11 }
  0x25   :  { %p2508_p0 = pnand %p2507_p13, %p2501_p10 }
  0x27   :  { %2511 = shalt.err (!%p2508_p0)
}
  0x28   :  { %100 = dma.hbm_to_vmem [thread:$0]  %s3129_s9, 16, %s98_s0, [#allocation14]  }
  0x29   :  { %s2669_s26 = smov [#allocation16]   ;;  %s2670_s28 = smov [#allocation4]  }
  0x2a   :  { %s121_s27 = sshll.u32 %s2669_s26, 4  ;;  %s36_s30 = sshll.u32 %s2670_s28, 4  ;;  %s122_s27 = int_to_ptr.vmem [resolvable:$true] %s121_s27  ;;  %s37_s30 = int_to_ptr.vmem [resolvable:$true] %s36_s30 }
  0x2b   :  { %s2520_s17 = scalar_lea.vmem %s122_s27, 16  ;;  %s2524_s7 = scalar_lea.vmem %s122_s27, 32 }
  0x2c   :  { %p2521_p1 = scmp.ne.s32.totalorder %s122_s27, %s2520_s17  ;;  %p2525_p2 = scmp.lt.s32.totalorder %s122_s27, %s122_s27 }
  0x2d   :  { %p2526_p3 = scmp.lt.s32.totalorder %s2524_s7, %s2520_s17 }
  0x2f   :  { %p2527_p4 = por %p2526_p3, %p2525_p2 }
  0x31   :  { %p2528_p5 = pnand %p2527_p4, %p2521_p1 }
  0x33   :  { %2531 = shalt.err (!%p2528_p5)
}
  0x34   :  { %124 = dma.hbm_to_vmem [thread:$0]  %s3133_s13, 16, %s122_s27, [#allocation17]  }
  0x35   :  { %s2540_s19 = scalar_lea.vmem %s37_s30, 192  ;;  %p2545_p7 = scmp.lt.s32.totalorder %s37_s30, %s37_s30 }
  0x36   :  { %p2541_p6 = scmp.ne.s32.totalorder %s37_s30, %s2540_s19  ;;  %p2546_p8 = scmp.lt.s32.totalorder %s2540_s19, %s2540_s19 }
  0x38   :  { %p2547_p9 = por %p2546_p8, %p2545_p7 }
  0x3a   :  { %p2548_p10 = pnand %p2547_p9, %p2541_p6 }
  0x3c   :  { %2551 = shalt.err (!%p2548_p10)
}
  0x3d   :  { %s2671_s9 = smov 64   ;;  %s2672_s0 = smov 4  }
  0x3e   :  { %42 = dma.hbm_to_vmem [thread:$0]  %s3122_s2, 192, %s37_s30, [#allocation5], %s2671_s9, %s2671_s9, %s2672_s0  }
  0x3f   :  { %s2673_s4 = smov [#allocation9]   ;;  %s2674_s13 = smov [#allocation12]  }
  0x40   :  { %s65_s22 = sshll.u32 %s2673_s4, 4  ;;  %s84_s23 = sshll.u32 %s2674_s13, 4  ;;  %s66_s22 = int_to_ptr.vmem [resolvable:$true] %s65_s22  ;;  %s85_s23 = int_to_ptr.vmem [resolvable:$true] %s84_s23 }
  0x41   :  { %s2560_s26 = scalar_lea.vmem %s66_s22, 64  ;;  %p2565_p12 = scmp.lt.s32.totalorder %s66_s22, %s66_s22 }
  0x42   :  { %p2561_p11 = scmp.ne.s32.totalorder %s66_s22, %s2560_s26  ;;  %p2566_p13 = scmp.lt.s32.totalorder %s2560_s26, %s2560_s26 }
  0x44   :  { %p2567_p0 = por %p2566_p13, %p2565_p12 }
  0x46   :  { %p2568_p1 = pnand %p2567_p0, %p2561_p11 }
  0x48   :  { %2571 = shalt.err (!%p2568_p1)
}
  0x49   :  { %68 = dma.hbm_to_vmem [thread:$0]  %s3126_s6, 64, %s66_s22, [#allocation8]  }
  0x4a   :  { %s2580_s17 = scalar_lea.vmem %s85_s23, 384  ;;  %p2585_p3 = scmp.lt.s32.totalorder %s85_s23, %s85_s23 }
  0x4b   :  { %p2581_p2 = scmp.ne.s32.totalorder %s85_s23, %s2580_s17  ;;  %p2586_p4 = scmp.lt.s32.totalorder %s2580_s17, %s2580_s17 }
  0x4d   :  { %p2587_p5 = por %p2586_p4, %p2585_p3 }
  0x4f   :  { %p2588_p6 = pnand %p2587_p5, %p2581_p2 }
  0x51   :  { %2591 = shalt.err (!%p2588_p6)
}
  0x52   :  { %90 = dma.hbm_to_vmem [thread:$0]  %s3128_s8, 384, %s85_s23, [#allocation11], %s2665_s24, %s2665_s24, %s2666_s25  }
  0x53   :  { %s2675_s7 = smov [#allocation15]   ;;  %s2676_s18 = smov [#allocation18]  }
  0x54   :  { %s109_s29 = sshll.u32 %s2675_s7, 4  ;;  %s130_s6 = sshll.u32 %s2676_s18, 4  ;;  %s110_s29 = int_to_ptr.vmem [resolvable:$true] %s109_s29  ;;  %s131_s6 = int_to_ptr.vmem [resolvable:$true] %s130_s6 }
  0x55   :  { %s2600_s19 = scalar_lea.vmem %s110_s29, 16  ;;  %s2604_s0 = scalar_lea.vmem %s110_s29, 32 }
  0x56   :  { %p2601_p7 = scmp.ne.s32.totalorder %s110_s29, %s2600_s19  ;;  %p2605_p8 = scmp.lt.s32.totalorder %s110_s29, %s110_s29 }
  0x57   :  { %p2606_p9 = scmp.lt.s32.totalorder %s2604_s0, %s2600_s19 }
  0x59   :  { %p2607_p10 = por %p2606_p9, %p2605_p8 }
  0x5b   :  { %p2608_p11 = pnand %p2607_p10, %p2601_p7 }
  0x5d   :  { %2611 = shalt.err (!%p2608_p11)
}
  0x5e   :  { %112 = dma.hbm_to_vmem [thread:$0]  %s3131_s11, 16, %s110_s29, [#allocation14]  }
  0x5f   :  { %s2620_s4 = scalar_lea.vmem %s131_s6, 1024  ;;  %p2625_p13 = scmp.lt.s32.totalorder %s131_s6, %s131_s6 }
  0x60   :  { %p2621_p12 = scmp.ne.s32.totalorder %s131_s6, %s2620_s4  ;;  %p2626_p0 = scmp.lt.s32.totalorder %s2620_s4, %s2620_s4 }
  0x62   :  { %p2627_p1 = por %p2626_p0, %p2625_p13 }
  0x64   :  { %p2628_p2 = pnand %p2627_p1, %p2621_p12 }
  0x66   :  { %2631 = shalt.err (!%p2628_p2)
}
  0x67   :  { %136 = dma.hbm_to_vmem [thread:$0]  %s3134_s14, 1024, %s131_s6, [#allocation17], %s2665_s24, %s2665_s24, %s2666_s25  }
  0x68   :  { %2652 = dma.done.wait [#allocation5], 192  }
  0x69   :  { %2653 = vsyncadd [#allocation5], 4294967104 }
  0x6a   :  { %2654 = dma.done.wait [#allocation8], 448  }
  0x6b   :  { %2655 = vsyncadd [#allocation8], 4294966848 }
  0x6c   :  { %2656 = dma.done.wait [#allocation11], 400  }
  0x6d   :  { %2657 = vsyncadd [#allocation11], 4294966896 }
  0x6e   :  { %2658 = dma.done.wait [#allocation14], 32  }
  0x6f   :  { %2659 = vsyncadd [#allocation14], 4294967264 }
  0x70   :  { %2660 = dma.done.wait [#allocation17], 1040  }
  0x71   :  { %2661 = vsyncadd [#allocation17], 4294966256  ;;  %v166_v0 = vlaneseq  ;;  %vm301_vm0 = vcmask 1043456   ;;  %vm257_vm1 = vcmask 1040384   ;;  %vm288_vm2 = vcmask 31744   ;;  %s3139_s24 = sld [smem:[#allocation26_spill]] }
  0x72   :  { %vm227_vm3 = vcmask 1041408   ;;  %v287_v5 = vld [vmem:[#allocation4 + $0x4] sm:$0xf]  ;;  %v256_v7 = vld [vmem:[#allocation4] sm:$0xf]  ;;  %v645_v32 = vld [vmem:[#allocation7 + $0x8] sm:$0xff] }
  0x73   :  { %v167_v1 = vshrl.u32 %v166_v0, 7  ;;  %2263 = vmatprep.subr.msk.mxu0 %vm301_vm0, %v287_v5  ;;  %2421 = vmatprep.subr.msk.mxu1 %vm301_vm0, %v256_v7  ;;  %v491_v27 = vld [vmem:[#allocation4 + $0x8] sm:$0xf]  ;;  %v627_v33 = vld [vmem:[#allocation7] sm:$0xff]  ;;  %v842_v34 = vld [vmem:[#allocation7 + $0x10] sm:$0xff]  ;;  %vm646_vm8 = vcmask 64512  }
  0x74   :  { %2264 = vmatpush3.msk.msra.mxu0 %vm301_vm0, %v287_v5  ;;  %2422 = vmatpush3.msk.msra.mxu1 %vm301_vm0, %v256_v7  ;;  %v955_v35 = vld [vmem:[#allocation9] sm:$0xf]  ;;  %v2121_v45 = vld [vmem:[%s3123_s3] ss:$0 sm:$0xff]  ;;  %s2678_s11 = smov 72   ;;  %s2679_s14 = smov 88  }
  0x75   :  { %v2816_v2 = vand.u32 15, %v167_v1  ;;  %v169_v3 = vadd.s32 16, %v167_v1  ;;  %2271 = vmatprep.subr.msk.mxu0 %vm301_vm0, %v256_v7  ;;  %2287 = vmatprep.subr.mxu1 %v645_v32  ;;  %vm1778_vm11 = vcmask 58368   ;;  %s2681_s26 = smov 24   ;;  %s2682_s2 = smov 32   ;;  %vm2686_vm12 = vmmov 0  }
  0x76   :  { %s2683_s30 = smov 16   ;;  %s2684_s7 = smov 48   ;;  %vm1786_vm13 = vcmask 123968   ;;  %vm1794_vm14 = vcmask 189568   ;;  %vm1802_vm15 = vcmask 255168  }
  0x77   :  { %v2818_v4 = vand.u32 15, %v169_v3  ;;  %v2823_v6 = vld [vmem:[%s3139_s24] sm:$0xff]  ;;  %vm270_vm4 = vcmp.ge.s32.totalorder %v2816_v2, 1  ;;  %v2831_v9 = vld [vmem:[%s3139_s24 + $0x8] sm:$0xff]  ;;  %v2837_v10 = vld [vmem:[%s3139_s24 + $0x10] sm:$0xff]  ;;  %vm240_vm7 = vcmp.ge.s32.totalorder %v2816_v2, 2 }
  0x78   :  { %v258_v8 = vrot.slane %v2823_v6, 7  ;;  %v2844_v11 = vld [vmem:[%s3139_s24 + $0x18] sm:$0xff]  ;;  %v259_v12 = vrot.slane %v2831_v9, 7  ;;  %v261_v13 = vrot.slane %v2837_v10, 7  ;;  %v229_v14 = vrot.slane %v2831_v9, 6  ;;  %s2680_s24 = smov 80  }
  0x79   :  { %vm272_vm5 = vcmp.ge.s32.totalorder %v2818_v4, 1  ;;  %vm242_vm6 = vcmp.ge.s32.totalorder %v2818_v4, 2  ;;  %v231_v15 = vrot.slane %v2837_v10, 6  ;;  %v263_v17 = vrot.slane %v2844_v11, 7  ;;  %s2687_s0 = smov 96   ;;  %s2689_s4 = smov 112  }
  0x7a   :  { %v269_v16 = vsel %vm257_vm1, 0.0, %v258_v8  ;;  %v233_v18 = vrot.slane %v2844_v11, 6  ;;  %v228_v19 = vrot.slane %v2823_v6, 6  ;;  %v260_v21 = vsel %vm257_vm1, %v258_v8, %v259_v12  ;;  %s2690_s8 = smov 104   ;;  %s2691_s13 = smov 120  }
  0x7b   :  { %v282_v20 = vsel %vm270_vm4, %v269_v16, 0.0  ;;  %v262_v22 = vsel %vm257_vm1, %v259_v12, %v261_v13  ;;  %v232_v23 = vsel %vm227_vm3, %v229_v14, %v231_v15  ;;  %v264_v29 = vsel %vm257_vm1, %v261_v13, %v263_v17 }
  0x7c   :  { %2265 = vmatprep.mubr.msk.f32.mxu0 %vm288_vm2, %v282_v20  ;;  %v284_v24 = vsel %vm272_vm5, %v262_v22, 0.0  ;;  %v254_v25 = vsel %vm242_vm6, %v232_v23, 0.0  ;;  %v234_v26 = vsel %vm227_vm3, %v231_v15, %v233_v18  ;;  %v239_v28 = vsel %vm227_vm3, 0.0, %v228_v19 }
  0x7d   :  { %2266 = vmatmul.mubr.msk.f32.vlgmr.msra.gmra.mxu0 %vm288_vm2, %v260_v21  ;;  %2276 = vmatprep.mubr.msk.f32.mxu1 %vm288_vm2, %v254_v25  ;;  %v252_v30 = vsel %vm240_vm7, %v239_v28, 0.0  ;;  %v230_v31 = vsel %vm227_vm3, %v228_v19, %v229_v14  ;;  %v1091_v28 = vld [vmem:[#allocation12] sm:$0xff]  ;;  %vm1075_vm9 = vcmp.ge.s32.totalorder %v2816_v2, 4  ;;  %vm1077_vm10 = vcmp.ge.s32.totalorder %v2818_v4, 4 }
  0x7e   :  { %2272 = vmatpush3.msk.msra.mxu0 %vm301_vm0, %v256_v7  ;;  %2268 = vmatprep.mubr.msk.f32.mxu0 %vm288_vm2, %v284_v24 }
  0x7f   :  { %2277 = vmatmul.mubr.msk.f32.vlgmr.msra.gmra.mxu1 %vm288_vm2, %v234_v26  ;;  %2279 = vmatprep.subr.msk.mxu0 %vm301_vm0, %v491_v27 }
  0x80   :  { %2288 = vmatpush3.msra.mxu1 %v645_v32 }
  0x81   :  { %2269 = vmatmul.mubr.msk.f32.gmra.mxu0 %vm288_vm2, %v264_v29  ;;  %2303 = vmatprep.subr.mxu1 %v842_v34 }
  0x82   :  { %2273 = vmatprep.mubr.msk.f32.mxu0 %vm288_vm2, %v252_v30 }
  0x85   :  { %2274 = vmatmul.mubr.msk.f32.vlgmr.msra.gmra.mxu0 %vm288_vm2, %v230_v31 }
  0x86   :  { %2280 = vmatpush3.msk.msra.mxu0 %vm301_vm0, %v491_v27  ;;  %2281 = vmatprep.mubr.msk.f32.mxu0 %vm288_vm2, %v2823_v6  ;;  %v1109_v27 = vld [vmem:[#allocation12 + $0x8] sm:$0xff] }
  0x87   :  { %2295 = vmatprep.subr.mxu0 %v627_v33 }
  0x89   :  { %2282 = vmatmul.mubr.msk.f32.vlgmr.msra.gmra.mxu0 %vm288_vm2, %v2831_v9 }
  0x8a   :  { %2284 = vmatprep.mubr.msk.f32.mxu0 %vm288_vm2, %v2837_v10  ;;  %2296 = vmatpush3.msra.mxu0 %v627_v33 }
  0x8b   :  { %2311 = vmatprep.subr.msk.mxu0 %vm301_vm0, %v955_v35 }
  0x8d   :  { %2285 = vmatmul.mubr.msk.f32.gmra.mxu0 %vm288_vm2, %v2844_v11 }
 0x13d   :  { %v2267_v36 = vpop.f32.mrf.mxu0 }
 0x13f   :  { %v371_v37 = vpop.f32.mrf.mxu0  ;;  %v2278_v42 = vpop.f32.mrf.mxu1 }
 0x141   :  { %v2270_v38 = vpop.f32.mrf.mxu0  ;;  %v481_v50 = vpop.f32.mrf.mxu1 }
 0x142   :  { %v487_v49 = vadd.f32 %v2278_v42, %v2270_v38  ;;  %v2135_v38 = vld [vmem:[#allocation10] ss:$0 sm:$0xff] }
 0x143   :  { %v381_v39 = vpop.f32.mrf.mxu0 }
 0x144   :  { %v482_v56 = vadd.f32 %v481_v50, %v381_v39 }
 0x145   :  { %v2275_v40 = vpop.f32.mrf.mxu0 }
 0x146   :  { %v477_v43 = vadd.f32 %v2275_v40, %v2267_v36  ;;  %v2134_v36 = vld [vmem:[%s3125_s5] ss:$0 sm:$0xff]  ;;  %s2685_s5 = smov 40  }
 0x147   :  { %v471_v41 = vpop.f32.mrf.mxu0 }
 0x148   :  { %v472_v46 = vadd.f32 %v471_v41, %v371_v37 }
 0x149   :  { %v2283_v44 = vpop.f32.mrf.mxu0 }
 0x14a   :  { %v589_v47 = vadd.f32 %v2283_v44, %v477_v43 }
 0x14b   :  { %v569_v48 = vpop.f32.mrf.mxu0 }
 0x14c   :  { %v600_v51 = vadd.f32 %v2121_v45, %v589_v47  ;;  %v588_v52 = vadd.f32 %v569_v48, %v472_v46 }
 0x14d   :  { %v2286_v53 = vpop.f32.mrf.mxu0 }
 0x14e   :  { %v599_v54 = vadd.f32 %v2121_v45, %v588_v52  ;;  %v591_v55 = vadd.f32 %v2286_v53, %v487_v49  ;;  %v604_v58 = vmax.f32 %v600_v51, 0.0 }
 0x14f   :  { %v579_v57 = vpop.f32.mrf.mxu0 }
 0x150   :  { %v603_v59 = vmax.f32 %v599_v54, 0.0  ;;  %v602_v60 = vadd.f32 %v2121_v45, %v591_v55  ;;  %v590_v61 = vadd.f32 %v579_v57, %v482_v56  ;;  %v612_v1 = vrot.slane %v604_v58, 6 }
 0x151   :  { %v629_v3 = vrot.slane %v604_v58, 7 }
 0x152   :  { %v628_v62 = vrot.slane %v603_v59, 7  ;;  %v611_v63 = vrot.slane %v603_v59, 6  ;;  %v601_v0 = vadd.f32 %v2121_v45, %v590_v61  ;;  %v606_v8 = vmax.f32 %v602_v60, 0.0 }
 0x154   :  { %v639_v5 = vsel %vm257_vm1, 0.0, %v628_v62  ;;  %v622_v7 = vsel %vm227_vm3, 0.0, %v611_v63  ;;  %v605_v12 = vmax.f32 %v601_v0, 0.0  ;;  %v630_v15 = vsel %vm257_vm1, %v628_v62, %v629_v3 }
 0x155   :  { %v640_v13 = vsel %vm270_vm4, %v639_v5, 0.0  ;;  %v623_v14 = vsel %vm240_vm7, %v622_v7, 0.0  ;;  %v613_v16 = vsel %vm227_vm3, %v611_v63, %v612_v1  ;;  %v616_v19 = vrot.slane %v606_v8, 6 }
 0x156   :  { %2289 = vmatprep.mubr.msk.f32.mxu1 %vm646_vm8, %v640_v13  ;;  %2297 = vmatprep.mubr.msk.f32.mxu0 %vm646_vm8, %v623_v14  ;;  %v614_v17 = vrot.slane %v605_v12, 6  ;;  %v631_v18 = vrot.slane %v605_v12, 7  ;;  %v633_v20 = vrot.slane %v606_v8, 7  ;;  %vm1842_vm4 = vcmask 583168  }
 0x157   :  { %2290 = vmatmul.mubr.msk.f32.vlgmr.msra.gmra.mxu1 %vm646_vm8, %v630_v15  ;;  %2298 = vmatmul.mubr.msk.f32.vlgmr.msra.gmra.mxu0 %vm646_vm8, %v613_v16 }
 0x158   :  { %2304 = vmatpush3.msra.mxu1 %v842_v34  ;;  %2312 = vmatpush3.msk.msra.mxu0 %vm301_vm0, %v955_v35  ;;  %v632_v21 = vsel %vm257_vm1, %v629_v3, %v631_v18  ;;  %v615_v22 = vsel %vm227_vm3, %v612_v1, %v614_v17  ;;  %v634_v25 = vsel %vm257_vm1, %v631_v18, %v633_v20  ;;  %vm1818_vm1 = vcmask 386368  }
 0x159   :  { %v642_v23 = vsel %vm272_vm5, %v632_v21, 0.0  ;;  %v625_v24 = vsel %vm242_vm6, %v615_v22, 0.0  ;;  %v617_v26 = vsel %vm227_vm3, %v614_v17, %v616_v19  ;;  %2319 = vmatprep.subr.mxu1 %v1109_v27  ;;  %2327 = vmatprep.subr.mxu0 %v1091_v28  ;;  %vm1850_vm5 = vcmask 648768  }
 0x15a   :  { %2292 = vmatprep.mubr.msk.f32.mxu1 %vm646_vm8, %v642_v23  ;;  %2300 = vmatprep.mubr.msk.f32.mxu0 %vm646_vm8, %v625_v24 }
 0x15b   :  { %2293 = vmatmul.mubr.msk.f32.gmra.mxu1 %vm646_vm8, %v634_v25  ;;  %2301 = vmatmul.mubr.msk.f32.gmra.mxu0 %vm646_vm8, %v617_v26 }
 0x15c   :  { %2305 = vmatprep.mubr.msk.f32.mxu1 %vm646_vm8, %v603_v59  ;;  %2313 = vmatprep.mubr.msk.f32.mxu0 %vm288_vm2, %v2823_v6  ;;  %v2933_v6 = vld [vmem:[#allocation12 + $0x10] sm:$0xff] }
 0x15f   :  { %2306 = vmatmul.mubr.msk.f32.vlgmr.msra.gmra.mxu1 %vm646_vm8, %v604_v58  ;;  %2314 = vmatmul.mubr.msk.f32.vlgmr.msra.gmra.mxu0 %vm288_vm2, %v2831_v9 }
 0x160   :  { %2308 = vmatprep.mubr.msk.f32.mxu1 %vm646_vm8, %v605_v12  ;;  %2316 = vmatprep.mubr.msk.f32.mxu0 %vm288_vm2, %v2837_v10 }
 0x161   :  { %2320 = vmatpush3.msra.mxu1 %v1109_v27  ;;  %2328 = vmatpush3.msra.mxu0 %v1091_v28 }
 0x162   :  { %2335 = vmatprep.subr.mxu1 %v2933_v6 }
 0x163   :  { %2309 = vmatmul.mubr.msk.f32.gmra.mxu1 %vm646_vm8, %v606_v8  ;;  %2317 = vmatmul.mubr.msk.f32.gmra.mxu0 %vm288_vm2, %v2844_v11  ;;  %vm1826_vm2 = vcmask 451968  }
 0x217   :  { %v2291_v9 = vpop.f32.mrf.mxu1  ;;  %v2299_v29 = vpop.f32.mrf.mxu0 }
 0x218   :  { %v828_v35 = vadd.f32 %v2299_v29, %v2291_v9 }
 0x219   :  { %v725_v30 = vpop.f32.mrf.mxu1  ;;  %v822_v31 = vpop.f32.mrf.mxu0 }
 0x21a   :  { %v823_v39 = vadd.f32 %v822_v31, %v725_v30 }
 0x21b   :  { %v2294_v10 = vpop.f32.mrf.mxu1  ;;  %v2302_v32 = vpop.f32.mrf.mxu0 }
 0x21c   :  { %v838_v43 = vadd.f32 %v2302_v32, %v2294_v10  ;;  %v2154_v10 = vld [vmem:[%s3130_s10 + $0x8] sm:$0xff]  ;;  %v1438_v32 = vld [vmem:[%s3130_s10] sm:$0xff] }
 0x21d   :  { %v735_v33 = vpop.f32.mrf.mxu1  ;;  %v832_v34 = vpop.f32.mrf.mxu0  ;;  %2343 = vmatprep.subr.mxu0 %v2154_v10 }
 0x21e   :  { %v833_v49 = vadd.f32 %v832_v34, %v735_v33  ;;  %v2163_v33 = vld [vmem:[%s3130_s10 + $0x10] sm:$0xff]  ;;  %s2688_s10 = smov 56  }
 0x21f   :  { %v2307_v11 = vpop.f32.mrf.mxu1  ;;  %v2315_v37 = vpop.f32.mrf.mxu0 }
 0x220   :  { %v937_v40 = vadd.f32 %v2307_v11, %v828_v35  ;;  %v1038_v46 = vadd.f32 %v2315_v37, %v2135_v38 }
 0x221   :  { %v917_v41 = vpop.f32.mrf.mxu1  ;;  %v1032_v42 = vpop.f32.mrf.mxu0 }
 0x222   :  { %v948_v44 = vadd.f32 %v2134_v36, %v937_v40  ;;  %v936_v45 = vadd.f32 %v917_v41, %v823_v39  ;;  %v1033_v53 = vadd.f32 %v2135_v38, %v1032_v42  ;;  %v2153_v42 = vld [vmem:[#allocation13] ss:$0 sm:$0xff] }
 0x223   :  { %v2310_v47 = vpop.f32.mrf.mxu1  ;;  %v2318_v48 = vpop.f32.mrf.mxu0 }
 0x224   :  { %v952_v50 = vmax.f32 %v948_v44, 0.0  ;;  %v947_v51 = vadd.f32 %v2134_v36, %v936_v45  ;;  %v939_v52 = vadd.f32 %v2310_v47, %v838_v43  ;;  %v1048_v59 = vadd.f32 %v2318_v48, %v2135_v38 }
 0x225   :  { %v927_v54 = vpop.f32.mrf.mxu1  ;;  %v1042_v60 = vpop.f32.mrf.mxu0 }
 0x226   :  { %v951_v55 = vmax.f32 %v947_v51, 0.0  ;;  %v1052_v56 = vadd.f32 %v1038_v46, %v952_v50  ;;  %v950_v57 = vadd.f32 %v2134_v36, %v939_v52  ;;  %v938_v58 = vadd.f32 %v927_v54, %v833_v49 }
 0x227   :  { %v1043_v5 = vadd.f32 %v2135_v38, %v1042_v60 }
 0x228   :  { %v954_v61 = vmax.f32 %v950_v57, 0.0  ;;  %v1051_v62 = vadd.f32 %v1033_v53, %v951_v55  ;;  %v949_v63 = vadd.f32 %v2134_v36, %v938_v58  ;;  %v2939_v0 = vmax.f32 %v1052_v56, 0.0 }
 0x22a   :  { %v2941_v1 = vmax.f32 %v1051_v62, 0.0  ;;  %v953_v3 = vmax.f32 %v949_v63, 0.0  ;;  %v1054_v7 = vadd.f32 %v1048_v59, %v954_v61  ;;  %v1064_v14 = vrot.slane %v2939_v0, 4 }
 0x22b   :  { %v1093_v15 = vrot.slane %v2939_v0, 6 }
 0x22c   :  { %v1053_v8 = vadd.f32 %v1043_v5, %v953_v3  ;;  %v1092_v12 = vrot.slane %v2941_v1, 6  ;;  %v1063_v13 = vrot.slane %v2941_v1, 4  ;;  %v2948_v16 = vmax.f32 %v1054_v7, 0.0 }
 0x22e   :  { %v2950_v17 = vmax.f32 %v1053_v8, 0.0  ;;  %v1103_v18 = vsel %vm227_vm3, 0.0, %v1092_v12  ;;  %v1074_v19 = vsel %vm301_vm0, 0.0, %v1063_v13  ;;  %v1094_v22 = vsel %vm227_vm3, %v1092_v12, %v1093_v15 }
 0x22f   :  { %v1104_v20 = vsel %vm240_vm7, %v1103_v18, 0.0  ;;  %v1087_v21 = vsel %vm1075_vm9, %v1074_v19, 0.0  ;;  %v1065_v23 = vsel %vm301_vm0, %v1063_v13, %v1064_v14  ;;  %v1097_v28 = vrot.slane %v2948_v16, 6 }
 0x230   :  { %2321 = vmatprep.mubr.msk.f32.mxu1 %vm646_vm8, %v1104_v20  ;;  %2329 = vmatprep.mubr.msk.f32.mxu0 %vm646_vm8, %v1087_v21  ;;  %v1095_v24 = vrot.slane %v2950_v17, 6  ;;  %v1066_v25 = vrot.slane %v2950_v17, 4  ;;  %v1068_v9 = vrot.slane %v2948_v16, 4 }
 0x231   :  { %2322 = vmatmul.mubr.msk.f32.vlgmr.msra.gmra.mxu1 %vm646_vm8, %v1094_v22  ;;  %2330 = vmatmul.mubr.msk.f32.vlgmr.msra.gmra.mxu0 %vm646_vm8, %v1065_v23 }
 0x232   :  { %2336 = vmatpush3.msra.mxu1 %v2933_v6  ;;  %v1096_v26 = vsel %vm227_vm3, %v1093_v15, %v1095_v24  ;;  %v1067_v27 = vsel %vm301_vm0, %v1064_v14, %v1066_v25  ;;  %v1098_v6 = vsel %vm227_vm3, %v1095_v24, %v1097_v28  ;;  %v1069_v31 = vsel %vm301_vm0, %v1066_v25, %v1068_v9 }
 0x233   :  { %v1106_v29 = vsel %vm242_vm6, %v1096_v26, 0.0  ;;  %v1089_v30 = vsel %vm1077_vm10, %v1067_v27, 0.0  ;;  %2344 = vmatpush3.msra.mxu0 %v2154_v10  ;;  %2351 = vmatprep.subr.mxu1 %v1438_v32 }
 0x234   :  { %2324 = vmatprep.mubr.msk.f32.mxu1 %vm646_vm8, %v1106_v29  ;;  %2332 = vmatprep.mubr.msk.f32.mxu0 %vm646_vm8, %v1089_v30 }
 0x235   :  { %2325 = vmatmul.mubr.msk.f32.gmra.mxu1 %vm646_vm8, %v1098_v6  ;;  %2333 = vmatmul.mubr.msk.f32.gmra.mxu0 %vm646_vm8, %v1069_v31 }
 0x236   :  { %2337 = vmatprep.mubr.msk.f32.mxu1 %vm646_vm8, %v2941_v1  ;;  %2359 = vmatprep.subr.mxu0 %v2163_v33 }
 0x239   :  { %2338 = vmatmul.mubr.msk.f32.vlgmr.msra.gmra.mxu1 %vm646_vm8, %v2939_v0 }
 0x23a   :  { %2340 = vmatprep.mubr.msk.f32.mxu1 %vm646_vm8, %v2950_v17  ;;  %2352 = vmatpush3.msra.mxu1 %v1438_v32  ;;  %v2168_v32 = vld [vmem:[#allocation15] ss:$0 sm:$0xff] }
 0x23d   :  { %2341 = vmatmul.mubr.msk.f32.gmra.mxu1 %vm646_vm8, %v2948_v16 }
 0x2f1   :  { %v2323_v34 = vpop.f32.mrf.mxu1  ;;  %v2331_v35 = vpop.f32.mrf.mxu0 }
 0x2f2   :  { %v1291_v39 = vadd.f32 %v2331_v35, %v2323_v34 }
 0x2f3   :  { %v1188_v11 = vpop.f32.mrf.mxu1  ;;  %v1285_v36 = vpop.f32.mrf.mxu0 }
 0x2f4   :  { %v1286_v43 = vadd.f32 %v1285_v36, %v1188_v11 }
 0x2f5   :  { %v2326_v37 = vpop.f32.mrf.mxu1  ;;  %v2334_v40 = vpop.f32.mrf.mxu0 }
 0x2f6   :  { %v1301_v46 = vadd.f32 %v2334_v40, %v2326_v37 }
 0x2f7   :  { %v1198_v38 = vpop.f32.mrf.mxu1  ;;  %v1295_v47 = vpop.f32.mrf.mxu0 }
 0x2f8   :  { %v1296_v53 = vadd.f32 %v1295_v47, %v1198_v38 }
 0x2f9   :  { %v2339_v41 = vpop.f32.mrf.mxu1 }
 0x2fa   :  { %v1400_v44 = vadd.f32 %v2339_v41, %v1291_v39 }
 0x2fb   :  { %v1380_v45 = vpop.f32.mrf.mxu1 }
 0x2fc   :  { %v1411_v48 = vadd.f32 %v2153_v42, %v1400_v44  ;;  %v1399_v49 = vadd.f32 %v1380_v45, %v1286_v43 }
 0x2fd   :  { %v2342_v50 = vpop.f32.mrf.mxu1 }
 0x2fe   :  { %v1410_v51 = vadd.f32 %v2153_v42, %v1399_v49  ;;  %v1402_v52 = vadd.f32 %v2342_v50, %v1301_v46  ;;  %v1415_v55 = vmax.f32 %v1411_v48, 0.0 }
 0x2ff   :  { %v1390_v54 = vpop.f32.mrf.mxu1 }
 0x300   :  { %v1414_v56 = vmax.f32 %v1410_v51, 0.0  ;;  %v1413_v57 = vadd.f32 %v2153_v42, %v1402_v52  ;;  %v1401_v58 = vadd.f32 %v1390_v54, %v1296_v53  ;;  %v1423_v62 = vrot.slane %v1415_v55, 4 }
 0x301   :  { %v1440_v63 = vrot.slane %v1415_v55, 6 }
 0x302   :  { %v1439_v59 = vrot.slane %v1414_v56, 6  ;;  %v1422_v60 = vrot.slane %v1414_v56, 4  ;;  %v1412_v61 = vadd.f32 %v2153_v42, %v1401_v58  ;;  %v1417_v7 = vmax.f32 %v1413_v57, 0.0 }
 0x303   :  { %v2677_v58 = vmov 0.0  }
 0x304   :  { %v1450_v3 = vsel %vm227_vm3, 0.0, %v1439_v59  ;;  %v1433_v5 = vsel %vm301_vm0, 0.0, %v1422_v60  ;;  %v1416_v8 = vmax.f32 %v1412_v61, 0.0  ;;  %v1441_v14 = vsel %vm227_vm3, %v1439_v59, %v1440_v63  ;;  %2367 = vmatprep.subr.mxu1 %v2677_v58 }
 0x305   :  { %v1451_v12 = vsel %vm240_vm7, %v1450_v3, 0.0  ;;  %v1434_v13 = vsel %vm1075_vm9, %v1433_v5, 0.0  ;;  %v1424_v15 = vsel %vm301_vm0, %v1422_v60, %v1423_v62  ;;  %v1427_v20 = vrot.slane %v1417_v7, 4 }
 0x306   :  { %2345 = vmatprep.mubr.msk.f32.mxu0 %vm646_vm8, %v1451_v12  ;;  %2353 = vmatprep.mubr.msk.f32.mxu1 %vm646_vm8, %v1434_v13  ;;  %v1425_v18 = vrot.slane %v1416_v8, 4  ;;  %v1442_v19 = vrot.slane %v1416_v8, 6  ;;  %v1444_v21 = vrot.slane %v1417_v7, 6  ;;  %vm1866_vm7 = vcmask 779968  }
 0x307   :  { %2346 = vmatmul.mubr.msk.f32.vlgmr.msra.gmra.mxu0 %vm646_vm8, %v1441_v14  ;;  %2354 = vmatmul.mubr.msk.f32.vlgmr.msra.gmra.mxu1 %vm646_vm8, %v1424_v15  ;;  %v1913_v14 = vld [vmem:[%s3132_s12 + $0x50] sm:$0xff]  ;;  %vm1882_vm9 = vcmask 911168  }
 0x308   :  { %2360 = vmatpush3.msra.mxu0 %v2163_v33  ;;  %v1443_v2 = vsel %vm227_vm3, %v1440_v63, %v1442_v19  ;;  %v1426_v22 = vsel %vm301_vm0, %v1423_v62, %v1425_v18  ;;  %v1445_v25 = vsel %vm227_vm3, %v1442_v19, %v1444_v21  ;;  %v1428_v26 = vsel %vm301_vm0, %v1425_v18, %v1427_v20  ;;  %v1912_v18 = vld [vmem:[%s3132_s12 + $0x48] sm:$0xff]  ;;  %v1911_v20 = vld [vmem:[%s3132_s12 + $0x40] sm:$0xff] }
 0x309   :  { %v1453_v23 = vsel %vm242_vm6, %v1443_v2, 0.0  ;;  %v1436_v24 = vsel %vm1077_vm10, %v1426_v22, 0.0  ;;  %2402 = vmatprep.subr.mxu0 %v2677_v58  ;;  %v1910_v22 = vld [vmem:[%s3132_s12 + $0x38] sm:$0xff]  ;;  %vm1810_vm0 = vcmask 320768   ;;  %vm1834_vm3 = vcmask 517568  }
 0x30a   :  { %2348 = vmatprep.mubr.msk.f32.mxu0 %vm646_vm8, %v1453_v23  ;;  %2356 = vmatprep.mubr.msk.f32.mxu1 %vm646_vm8, %v1436_v24  ;;  %v1909_v23 = vld [vmem:[%s3132_s12 + $0x30] sm:$0xff]  ;;  %vm1858_vm6 = vcmask 714368   ;;  %vm1890_vm10 = vcmask 976768  }
 0x30b   :  { %2349 = vmatmul.mubr.msk.f32.gmra.mxu0 %vm646_vm8, %v1445_v25  ;;  %2357 = vmatmul.mubr.msk.f32.gmra.mxu1 %vm646_vm8, %v1428_v26  ;;  %v1908_v26 = vld [vmem:[%s3132_s12 + $0x28] sm:$0xff] }
 0x30c   :  { %2361 = vmatprep.mubr.msk.f32.mxu0 %vm646_vm8, %v1414_v56  ;;  %2399 = vmatprep.mubr.msk.f32.mxu1 %vm2686_vm12, %v2677_v58 }
 0x30f   :  { %2362 = vmatmul.mubr.msk.f32.vlgmr.msra.gmra.mxu0 %vm646_vm8, %v1415_v55 }
 0x310   :  { %2364 = vmatprep.mubr.msk.f32.mxu0 %vm646_vm8, %v1416_v8  ;;  %v1914_v8 = vld [vmem:[%s3132_s12 + $0x58] sm:$0xff] }
 0x313   :  { %2365 = vmatmul.mubr.msk.f32.gmra.mxu0 %vm646_vm8, %v1417_v7  ;;  %v1915_v7 = vld [vmem:[%s3132_s12 + $0x60] sm:$0xff] }
 0x314   :  { %2418 = vmatprep.mubr.msk.f32.mxu0 %vm2686_vm12, %v2677_v58  ;;  %vm2012_vm12 = vcmask 523264  }
 0x3c7   :  { %v2347_v4 = vpop.f32.mrf.mxu0  ;;  %v2355_v27 = vpop.f32.mrf.mxu1 }
 0x3c8   :  { %v1638_v31 = vadd.f32 %v2355_v27, %v2347_v4  ;;  %v2004_v4 = vld [vmem:[#allocation18 + $0x38] sm:$0xff] }
 0x3c9   :  { %v1535_v28 = vpop.f32.mrf.mxu0  ;;  %v1632_v9 = vpop.f32.mrf.mxu1  ;;  %v1907_v27 = vld [vmem:[%s3132_s12 + $0x20] sm:$0xff]  ;;  %2403 = vmatpush3.msra.mxu0 %v2004_v4 }
 0x3ca   :  { %v1633_v33 = vadd.f32 %v1632_v9, %v1535_v28  ;;  %v2003_v28 = vld [vmem:[#allocation18 + $0x30] sm:$0xff]  ;;  %2404 = vmatprep.subr.mxu0 %v2677_v58 }
 0x3cb   :  { %v2350_v29 = vpop.f32.mrf.mxu0  ;;  %v2358_v30 = vpop.f32.mrf.mxu1  ;;  %2405 = vmatpush3.msra.mxu0 %v2003_v28 }
 0x3cc   :  { %v1648_v36 = vadd.f32 %v2358_v30, %v2350_v29  ;;  %v1906_v29 = vld [vmem:[%s3132_s12 + $0x18] sm:$0xff]  ;;  %2406 = vmatprep.subr.mxu0 %v2677_v58 }
 0x3cd   :  { %v1545_v6 = vpop.f32.mrf.mxu0  ;;  %v1642_v35 = vpop.f32.mrf.mxu1  ;;  %v2002_v30 = vld [vmem:[#allocation18 + $0x28] sm:$0xff] }
 0x3ce   :  { %v1643_v40 = vadd.f32 %v1642_v35, %v1545_v6  ;;  %v1905_v6 = vld [vmem:[%s3132_s12 + $0x10] sm:$0xff]  ;;  %2407 = vmatpush3.msra.mxu0 %v2002_v30 }
 0x3cf   :  { %v2363_v10 = vpop.f32.mrf.mxu0  ;;  %2408 = vmatprep.subr.mxu0 %v2677_v58 }
 0x3d0   :  { %v1747_v34 = vadd.f32 %v2363_v10, %v1638_v31  ;;  %v2001_v31 = vld [vmem:[#allocation18 + $0x20] sm:$0xff] }
 0x3d1   :  { %v1727_v11 = vpop.f32.mrf.mxu0  ;;  %v1904_v10 = vld [vmem:[%s3132_s12 + $0x8] sm:$0xff]  ;;  %2409 = vmatpush3.msra.mxu0 %v2001_v31 }
 0x3d2   :  { %v1758_v37 = vadd.f32 %v2168_v32, %v1747_v34  ;;  %v1746_v38 = vadd.f32 %v1727_v11, %v1633_v33  ;;  %v1903_v33 = vld [vmem:[%s3132_s12] sm:$0xff]  ;;  %2410 = vmatprep.subr.mxu0 %v2677_v58 }
 0x3d3   :  { %v2366_v39 = vpop.f32.mrf.mxu0 }
 0x3d4   :  { %v1762_v41 = vmax.f32 %v1758_v37, 0.0  ;;  %v1757_v42 = vadd.f32 %v2168_v32, %v1746_v38  ;;  %v1749_v43 = vadd.f32 %v2366_v39, %v1648_v36 }
 0x3d5   :  { %v1737_v44 = vpop.f32.mrf.mxu0 }
 0x3d6   :  { %v1766_v45 = vadd.f32 %v1762_v41, %v2939_v0  ;;  %v1761_v46 = vmax.f32 %v1757_v42, 0.0  ;;  %v1760_v47 = vadd.f32 %v2168_v32, %v1749_v43  ;;  %v1748_v48 = vadd.f32 %v1737_v44, %v1643_v40  ;;  %v1918_v0 = vld [vmem:[%s3132_s12 + $0x78] sm:$0xff] }
 0x3d7   :  { %2368 = vmatpush3.msra.mxu1 %v1918_v0 }
 0x3d8   :  { %v1770_v49 = vmax.f32 %v1766_v45, 0.0  ;;  %v1765_v50 = vadd.f32 %v1761_v46, %v2941_v1  ;;  %v1764_v51 = vmax.f32 %v1760_v47, 0.0  ;;  %v1759_v52 = vadd.f32 %v2168_v32, %v1748_v48  ;;  %2369 = vmatprep.subr.mxu1 %v2677_v58  ;;  %v2000_v32 = vld [vmem:[#allocation18 + $0x18] sm:$0xff]  ;;  %v1901_v48 = vld [vmem:[%s3121_s1] sm:$0x3] }
 0x3d9   :  { %2411 = vmatpush3.msra.mxu0 %v2000_v32 }
 0x3da   :  { %1774 = vst.msk [vmem:[#allocation2 + $0x8] sm:$0xff] %vm646_vm8, %v1770_v49  ;;  %v1769_v53 = vmax.f32 %v1765_v50, 0.0  ;;  %v1768_v54 = vadd.f32 %v1764_v51, %v2948_v16  ;;  %v1763_v55 = vmax.f32 %v1759_v52, 0.0  ;;  %v1917_v16 = vld [vmem:[%s3132_s12 + $0x70] sm:$0xff]  ;;  %2412 = vmatprep.subr.mxu0 %v2677_v58  ;;  %v1999_v51 = vld [vmem:[#allocation18 + $0x10] sm:$0xff] }
 0x3db   :  { %2370 = vmatpush3.msra.mxu1 %v1917_v16  ;;  %v1998_v52 = vld [vmem:[#allocation18 + $0x8] sm:$0xff]  ;;  %2413 = vmatpush3.msra.mxu0 %v1999_v51 }
 0x3dc   :  { %1773 = vst.msk [vmem:[#allocation2] sm:$0xff] %vm646_vm8, %v1769_v53  ;;  %v1772_v56 = vmax.f32 %v1768_v54, 0.0  ;;  %v1767_v57 = vadd.f32 %v1763_v55, %v2950_v17  ;;  %v1916_v17 = vld [vmem:[%s3132_s12 + $0x68] sm:$0xff]  ;;  %2371 = vmatprep.subr.mxu1 %v2677_v58  ;;  %2414 = vmatprep.subr.mxu0 %v2677_v58 }
 0x3dd   :  { %2372 = vmatpush3.msra.mxu1 %v1916_v17  ;;  %v1997_v53 = vld [vmem:[#allocation18] sm:$0xff]  ;;  %2415 = vmatpush3.msra.mxu0 %v1998_v52  ;;  %v2169_v54 = vld [vmem:[#allocation16] ss:$0 sm:$0xff] }
 0x3de   :  { %1776 = vst.msk [vmem:[#allocation2 + $0x18] sm:$0xff] %vm646_vm8, %v1772_v56  ;;  %v1771_v1 = vmax.f32 %v1767_v57, 0.0  ;;  %2373 = vmatprep.subr.mxu1 %v2677_v58  ;;  %2416 = vmatprep.subr.mxu0 %v2677_v58 }
 0x3df   :  { %2374 = vmatpush3.msra.mxu1 %v1915_v7  ;;  %2417 = vmatpush3.msra.mxu0 %v1997_v53 }
 0x3e0   :  { %1775 = vst.msk [vmem:[#allocation2 + $0x10] sm:$0xff] %vm646_vm8, %v1771_v1  ;;  %2375 = vmatprep.subr.mxu1 %v2677_v58  ;;  %vm1874_vm8 = vcmask 845568   ;;  %v2170_v1 = vld [vmem:[%s3135_s15] ss:$0 sm:$0xff] }
 0x3e1   :  { %2376 = vmatpush3.msra.mxu1 %v1914_v8 }
 0x3e2   :  { %2377 = vmatprep.subr.mxu1 %v2677_v58 }
 0x3e3   :  { %2378 = vmatpush3.msra.mxu1 %v1913_v14 }
 0x3e4   :  { %2379 = vmatprep.subr.mxu1 %v2677_v58 }
 0x3e5   :  { %v1845_v59 = vld [vmem:[#allocation2 + $0x9] ss:$16 sm:$0x3]  ;;  %v1837_v60 = vld [vmem:[#allocation2 + $0x8] ss:$16 sm:$0x3]  ;;  %2380 = vmatpush3.msra.mxu1 %v1912_v18 }
 0x3e6   :  { %1847 = vrot.lane.b32.xlu0 %v1845_v59, %s2678_s11  ;;  %1839 = vrot.lane.b32.xlu1 %v1837_v60, %s2671_s9  ;;  %v1861_v61 = vld [vmem:[#allocation2 + $0xb] ss:$16 sm:$0x3]  ;;  %v1853_v62 = vld [vmem:[#allocation2 + $0xa] ss:$16 sm:$0x3] }
 0x3e7   :  { %v1797_v63 = vld [vmem:[#allocation2 + $0x3] ss:$16 sm:$0x3]  ;;  %v1777_v3 = vld [vmem:[#allocation2] ss:$16 sm:$0x3]  ;;  %2381 = vmatprep.subr.mxu1 %v2677_v58 }
 0x3e8   :  { %v1781_v5 = vld [vmem:[#allocation2 + $0x1] ss:$16 sm:$0x3]  ;;  %1779 = vst.msk [vmem:[#allocation3] sm:$0x3] %vm1778_vm11, %v1777_v3  ;;  %2382 = vmatpush3.msra.mxu1 %v1911_v20  ;;  %vm1898_vm11 = vcmask 1042368  }
 0x3e9   :  { %v1805_v12 = vld [vmem:[#allocation2 + $0x4] ss:$16 sm:$0x3]  ;;  %v1789_v13 = vld [vmem:[#allocation2 + $0x2] ss:$16 sm:$0x3]  ;;  %2383 = vmatprep.subr.mxu1 %v2677_v58 }
 0x3ea   :  { %1863 = vrot.lane.b32.xlu0 %v1861_v61, %s2679_s14  ;;  %1855 = vrot.lane.b32.xlu1 %v1853_v62, %s2680_s24  ;;  %v1821_v15 = vld [vmem:[#allocation2 + $0x6] ss:$16 sm:$0x3]  ;;  %v1813_v19 = vld [vmem:[#allocation2 + $0x5] ss:$16 sm:$0x3] }
 0x3eb   :  { %v1869_v21 = vld [vmem:[#allocation2 + $0xc] ss:$16 sm:$0x3]  ;;  %v1829_v2 = vld [vmem:[#allocation2 + $0x7] ss:$16 sm:$0x3]  ;;  %2384 = vmatpush3.msra.mxu1 %v1910_v22 }
 0x3ec   :  { %v1885_v24 = vld [vmem:[#allocation2 + $0xe] ss:$16 sm:$0x3]  ;;  %v1877_v25 = vld [vmem:[#allocation2 + $0xd] ss:$16 sm:$0x3]  ;;  %2385 = vmatprep.subr.mxu1 %v2677_v58 }
 0x3ed   :  { %2386 = vmatpush3.msra.mxu1 %v1909_v23  ;;  %v1893_v9 = vld [vmem:[#allocation2 + $0xf] ss:$16 sm:$0x3] }
 0x3ee   :  { %1799 = vrot.lane.b32.xlu1 %v1797_v63, %s2681_s26  ;;  %1783 = vrot.lane.b32.xlu0 %v1781_v5, %s2666_s25 }
 0x3ef   :  { %2387 = vmatprep.subr.mxu1 %v2677_v58 }
 0x3f0   :  { %2388 = vmatpush3.msra.mxu1 %v1908_v26 }
 0x3f1   :  { %2389 = vmatprep.subr.mxu1 %v2677_v58 }
 0x3f2   :  { %1807 = vrot.lane.b32.xlu1 %v1805_v12, %s2682_s2  ;;  %1791 = vrot.lane.b32.xlu0 %v1789_v13, %s2683_s30 }
 0x3f3   :  { %2390 = vmatpush3.msra.mxu1 %v1907_v27 }
 0x3f4   :  { %2391 = vmatprep.subr.mxu1 %v2677_v58 }
 0x3f5   :  { %2392 = vmatpush3.msra.mxu1 %v1906_v29 }
 0x3f6   :  { %1823 = vrot.lane.b32.xlu1 %v1821_v15, %s2684_s7  ;;  %1815 = vrot.lane.b32.xlu0 %v1813_v19, %s2685_s5  ;;  %s2692_s7 = smov [#allocation19]  }
 0x3f7   :  { %2393 = vmatprep.subr.mxu1 %v2677_v58  ;;  %s2093_s5 = sshll.u32 %s2692_s7, 4  ;;  %s2094_s5 = int_to_ptr.vmem [resolvable:$true] %s2093_s5 }
 0x3f8   :  { %2394 = vmatpush3.msra.mxu1 %v1905_v6  ;;  %s2632_s29 = scalar_lea.vmem %s2094_s5, 32  ;;  %p2637_p4 = scmp.lt.s32.totalorder %s2094_s5, %s2094_s5 }
 0x3f9   :  { %2395 = vmatprep.subr.mxu1 %v2677_v58  ;;  %p2633_p3 = scmp.ne.s32.totalorder %s2094_s5, %s2632_s29  ;;  %p2638_p5 = scmp.lt.s32.totalorder %s2632_s29, %s2632_s29 }
 0x3fa   :  { %1871 = vrot.lane.b32.xlu1 %v1869_v21, %s2687_s0  ;;  %1831 = vrot.lane.b32.xlu0 %v1829_v2, %s2688_s10 }
 0x3fb   :  { %2396 = vmatpush3.msra.mxu1 %v1904_v10  ;;  %p2639_p6 = por %p2638_p5, %p2637_p4 }
 0x3fc   :  { %2397 = vmatprep.subr.mxu1 %v2677_v58 }
 0x3fd   :  { %2398 = vmatpush3.msra.mxu1 %v1903_v33  ;;  %p2640_p7 = pnand %p2639_p6, %p2633_p3 }
 0x3fe   :  { %1887 = vrot.lane.b32.xlu1 %v1885_v24, %s2689_s4  ;;  %1879 = vrot.lane.b32.xlu0 %v1877_v25, %s2690_s8 }
 0x402   :  { %1895 = vrot.lane.b32.xlu0 %v1893_v9, %s2691_s13 }
 0x458   :  { %v1848_v34 = vpop.permute.xlu0 %1847  ;;  %v1840_v35 = vpop.permute.xlu1 %1839 }
 0x45c   :  { %v1864_v11 = vpop.permute.xlu0 %1863  ;;  %v1856_v36 = vpop.permute.xlu1 %1855 }
 0x460   :  { %v1800_v37 = vpop.permute.xlu1 %1799  ;;  %v1784_v38 = vpop.permute.xlu0 %1783 }
 0x461   :  { %1787 = vst.msk [vmem:[#allocation3] sm:$0x3] %vm1786_vm13, %v1784_v38 }
 0x464   :  { %v1808_v39 = vpop.permute.xlu1 %1807  ;;  %v1792_v40 = vpop.permute.xlu0 %1791 }
 0x465   :  { %1795 = vst.msk [vmem:[#allocation3] sm:$0x3] %vm1794_vm14, %v1792_v40 }
 0x466   :  { %1803 = vst.msk [vmem:[#allocation3] sm:$0x3] %vm1802_vm15, %v1800_v37 }
 0x467   :  { %1811 = vst.msk [vmem:[#allocation3] sm:$0x3] %vm1810_vm0, %v1808_v39 }
 0x468   :  { %v1824_v41 = vpop.permute.xlu1 %1823  ;;  %v1816_v42 = vpop.permute.xlu0 %1815 }
 0x469   :  { %1819 = vst.msk [vmem:[#allocation3] sm:$0x3] %vm1818_vm1, %v1816_v42 }
 0x46a   :  { %1827 = vst.msk [vmem:[#allocation3] sm:$0x3] %vm1826_vm2, %v1824_v41 }
 0x46c   :  { %v1832_v43 = vpop.permute.xlu0 %1831  ;;  %v1872_v44 = vpop.permute.xlu1 %1871 }
 0x46d   :  { %1835 = vst.msk [vmem:[#allocation3] sm:$0x3] %vm1834_vm3, %v1832_v43 }
 0x46e   :  { %1843 = vst.msk [vmem:[#allocation3] sm:$0x3] %vm1842_vm4, %v1840_v35 }
 0x46f   :  { %1851 = vst.msk [vmem:[#allocation3] sm:$0x3] %vm1850_vm5, %v1848_v34 }
 0x470   :  { %v1880_v45 = vpop.permute.xlu0 %1879  ;;  %1859 = vst.msk [vmem:[#allocation3] sm:$0x3] %vm1858_vm6, %v1856_v36  ;;  %v1888_v46 = vpop.permute.xlu1 %1887 }
 0x471   :  { %1867 = vst.msk [vmem:[#allocation3] sm:$0x3] %vm1866_vm7, %v1864_v11 }
 0x472   :  { %1875 = vst.msk [vmem:[#allocation3] sm:$0x3] %vm1874_vm8, %v1872_v44 }
 0x473   :  { %1883 = vst.msk [vmem:[#allocation3] sm:$0x3] %vm1882_vm9, %v1880_v45 }
 0x474   :  { %v1896_v47 = vpop.permute.xlu0 %1895  ;;  %1891 = vst.msk [vmem:[#allocation3] sm:$0x3] %vm1890_vm10, %v1888_v46 }
 0x475   :  { %1899 = vst.msk [vmem:[#allocation3] sm:$0x3] %vm1898_vm11, %v1896_v47 }
 0x47c   :  { %v1900_v49 = vld [vmem:[#allocation3] sm:$0x3] }
 0x47d   :  { %v1902_v50 = vadd.f32 %v1901_v48, %v1900_v49 }
 0x47f   :  { %2400 = vmatmul.mubr.f32.vlgmr.msra.gmra.mxu1 %v1902_v50 }
 0x53f   :  { %v1992_v55 = vpop.f32.mrf.mxu1 }
 0x540   :  { %v1993_v56 = vadd.f32 %v2169_v54, %v1992_v55 }
 0x541   :  { %v2401_v57 = vpop.f32.mrf.mxu1 }
 0x542   :  { %v1996_v0 = vmax.f32 %v1993_v56, 0.0 }
 0x544   :  { %2419 = vmatmul.mubr.msk.f32.vlgmr.msra.gmra.mxu0 %vm2012_vm12, %v1996_v0 }
 0x604   :  { %v2082_v16 = vpop.f32.mrf.mxu0 }
 0x605   :  { %v2083_v17 = vadd.f32 %v2170_v1, %v2082_v16 }
 0x606   :  { %v2420_v59 = vpop.f32.mrf.mxu0 }
 0x607   :  { %2086 = vst [vmem:[#allocation19] sm:$0x3] %v2083_v17 }
 0x608   :  { %2643 = shalt.err (!%p2640_p7)
}
 0x609   :  { %2096 = dma.vmem_to_hbm [thread:$0]  %s2094_s5, 32, %s3136_s16, [#allocation6]  }
 0x60a   :  { %2662 = dma.done.wait [#allocation6], 32  }
 0x60b   :  { %2663 = vsyncadd [#allocation6], 4294967264 }
 0x60c   :  { %2100 = vsyncpa [#allocation5], 1 }
 0x60d   :  { %2101 = vsyncpa [#allocation8], 1 }
 0x60e   :  { %2102 = vsyncpa [#allocation11], 1 }
 0x60f   :  { %2103 = vsyncpa [#allocation14], 1 }
 0x610   :  { %2104 = vsyncpa [#allocation17], 1 }
 0x611   :  { %2105 = vsyncpa [#allocation6], 1 }

</bundles_post_ra>
